<compile_context>
chip_gen: v5e
topology: v5e:2x2
jax: 0.10.0
libtpu: 0.0.40
codegen_flags: <defaults>
</compile_context>

<pallas_src>
import jax
import jax.numpy as jnp
from jax.experimental import pallas as pl
from jax.experimental.pallas import tpu as pltpu

LN_EPS = 1e-5       # torch.nn.LayerNorm default eps
_PARAM_ROWS = 8     # (bias, gamma, beta) packed + padded to a full 8-sublane tile


def _round_up(n, m):
    return ((n + m - 1) // m) * m


def _cdiv(a, b):
    return (a + b - 1) // b


# ---------------------------------------------------------------------------
# One-time feature detection: does this Pallas build accept pipeline_mode?
# (Constructing a BlockSpec is cheap; no kernel compile involved.)
# ---------------------------------------------------------------------------
def _detect_pipeline_mode():
    if not hasattr(pl, "Buffered"):
        return False
    try:
        pl.BlockSpec((8, 128), lambda i: (i, 0), pipeline_mode=pl.Buffered(1))
        return True
    except TypeError:
        return False


_HAS_PIPELINE_MODE = _detect_pipeline_mode()


def _tpu_preset():
    """Per-generation tiling / VMEM presets.

    v7x: 64 MiB VMEM per TC -> smaller budget with headroom, and 2 TCs -> keep
    at least 2 batch tiles.  v5e/v6e: 128 MiB VMEM -> bigger batch/K tiles so w1
    is re-streamed fewer times.
    """
    kind = ""
    try:
        kind = jax.devices()[0].device_kind.lower()
    except Exception:
        pass
    if "v7" in kind:
        return dict(tile_b=256, max_tile_k=1024,
                    vmem_limit=48 * 1024 * 1024, two_cores=True)
    if "v5" in kind or "v6" in kind:
        return dict(tile_b=512, max_tile_k=2048,
                    vmem_limit=96 * 1024 * 1024, two_cores=False)
    # Unknown chip: conservative tiles, let Mosaic pick its own VMEM limit.
    return dict(tile_b=256, max_tile_k=1024, vmem_limit=None, two_cores=False)


def _pick_tile_k(input_dim, max_tile_k):
    """Multiple of 128 (<= max_tile_k) minimizing K padding; prefer larger tiles."""
    max_tile_k = max(128, (max_tile_k // 128) * 128)
    k_aligned = _round_up(input_dim, 128)
    if k_aligned <= max_tile_k:
        return k_aligned  # single K step, minimal (<128 col) pad
    best_t, best_key = 128, None
    for t in range(128, max_tile_k + 1, 128):
        pad = _round_up(input_dim, t) - input_dim
        key = (pad, -t)  # minimize pad, then prefer bigger tile (fewer grid steps)
        if best_key is None or key < best_key:
            best_key, best_t = key, t
    return best_t


def _pad_param_rows(p):
    """Pad packed (bias, gamma, beta) rows up to a full 8-sublane tile."""
    rows = p.shape[0]
    if rows < _PARAM_ROWS:
        p = jnp.pad(p, ((0, _PARAM_ROWS - rows), (0, 0)))
    return p


def _layer_norm(h, gamma, beta):
    # Single-pass stats (E[x], E[x^2]); biased variance & eps placement match
    # torch.nn.LayerNorm.
    mean = jnp.mean(h, axis=-1, keepdims=True)
    msq = jnp.mean(h * h, axis=-1, keepdims=True)
    var = jnp.maximum(msq - mean * mean, 0.0)
    return (h - mean) * jax.lax.rsqrt(var + LN_EPS) * gamma + beta


def ortholog_encoder_kernel(x_ref, w1_ref, p1_ref, w2_ref, p2_ref, o_ref, acc_ref):
    """Grid = (batch tiles, K tiles). K is the reduction axis of the first Linear."""
    k = pl.program_id(1)

    @pl.when(k == 0)
    def _():
        acc_ref[...] = jnp.zeros_like(acc_ref)

    # Partial first Linear: cast the f32 x tile to the MXU dtype in-kernel and
    # accumulate in f32.
    acc_ref[...] += jnp.dot(
        x_ref[...].astype(w1_ref.dtype), w1_ref[...],
        preferred_element_type=jnp.float32,
    )

    @pl.when(k == pl.num_programs(1) - 1)
    def _():
        # ---- full_block 1 epilogue: +bias -> LayerNorm -> ReLU -> (Dropout=id)
        p1 = p1_ref[...]                       # [8, hidden]: rows 0..2 = b/gamma/beta
        h = acc_ref[...] + p1[0:1, :]
        h = _layer_norm(h, p1[1:2, :], p1[2:3, :])
        h = jnp.maximum(h, 0.0)

        # ---- full_block 2: Linear -> LayerNorm -> ReLU -> (Dropout=id)
        p2 = p2_ref[...]                       # [8, embed]
        e = jnp.dot(h.astype(w2_ref.dtype), w2_ref[...],
                    preferred_element_type=jnp.float32)
        e = e + p2[0:1, :]
        e = _layer_norm(e, p2[1:2, :], p2[2:3, :])
        e = jnp.maximum(e, 0.0)

        o_ref[...] = e.astype(o_ref.dtype)


def make_ortholog_encoder(params, *, compute_dtype=jnp.bfloat16,
                          tile_b=None, max_tile_k=None, vmem_limit_bytes=None):
    """One-time weight prep (bf16 cast + K pad + param-row pad) -> forward(x) callable.

    params = (w1 [input_dim, hidden], p1 [3, hidden] = (bias, gamma, beta),
              w2 [hidden, embed],     p2 [3, embed]).
    """
    preset = _tpu_preset()
    tile_b = preset["tile_b"] if tile_b is None else tile_b
    max_tile_k = preset["max_tile_k"] if max_tile_k is None else max_tile_k
    if vmem_limit_bytes is None:
        vmem_limit_bytes = preset["vmem_limit"]
    two_cores = preset["two_cores"]

    w1, p1, w2, p2 = params
    input_dim, hidden_dim = w1.shape
    embed_dim = w2.shape[1]

    # K tiling over input_dim (stream w1 instead of holding it resident).
    tile_k = _pick_tile_k(input_dim, max_tile_k)
    k_pad = _round_up(input_dim, tile_k)
    n_k = k_pad // tile_k

    # One-time weight prep (hoisted out of the per-call forward).
    w1c = w1.astype(compute_dtype)
    if k_pad != input_dim:
        w1c = jnp.pad(w1c, ((0, k_pad - input_dim), (0, 0)))
    w2c = w2.astype(compute_dtype)
    p1c = _pad_param_rows(p1.astype(jnp.float32))
    p2c = _pad_param_rows(p2.astype(jnp.float32))
    bf_bytes = jnp.dtype(compute_dtype).itemsize

    def forward(x, species=None):
        del species  # unused by the PyTorch forward
        B = x.shape[0]
        assert x.shape[1] == input_dim, "input_dim mismatch"

        # Batch tiling: f32 x tile -> sublane multiple of 8.
        tb = max(8, min(tile_b, _round_up(B, 8)))
        if two_cores and B > 8:
            # Keep >= 2 batch tiles so both v7x TensorCores get work.
            tb = min(tb, max(8, _round_up(_cdiv(B, 2), 8)))
        tb = _round_up(tb, 8)
        b_pad = _round_up(B, tb)
        n_b = b_pad // tb

        x_in = x.astype(jnp.float32)
        if b_pad != B or k_pad != input_dim:
            x_in = jnp.pad(x_in, ((0, b_pad - B), (0, k_pad - input_dim)))

        cost = pl.CostEstimate(
            flops=2 * b_pad * (k_pad * hidden_dim + hidden_dim * embed_dim),
            transcendentals=2 * b_pad,  # one rsqrt per row per LayerNorm
            bytes_accessed=(
                b_pad * k_pad * 4                        # x (f32, read once)
                + n_b * k_pad * hidden_dim * bf_bytes    # w1 re-streamed per batch tile
                + hidden_dim * embed_dim * bf_bytes      # w2 (constant block, once)
                + (p1c.size + p2c.size) * 4
                + b_pad * embed_dim * 4                  # output writeback
            ),
        )

        def build(single_buffer_consts):
            const_kw = ({"pipeline_mode": pl.Buffered(1)}
                        if (single_buffer_consts and _HAS_PIPELINE_MODE) else {})
            in_specs = [
                pl.BlockSpec((tb, tile_k), lambda i, k: (i, k)),          # x tile (f32)
                pl.BlockSpec((tile_k, hidden_dim), lambda i, k: (k, 0)),  # w1 stream
                pl.BlockSpec((_PARAM_ROWS, hidden_dim), lambda i, k: (0, 0), **const_kw),
                pl.BlockSpec((hidden_dim, embed_dim), lambda i, k: (0, 0), **const_kw),
                pl.BlockSpec((_PARAM_ROWS, embed_dim), lambda i, k: (0, 0), **const_kw),
            ]
            return pl.pallas_call(
                ortholog_encoder_kernel,
                out_shape=jax.ShapeDtypeStruct((b_pad, embed_dim), jnp.float32),
                grid_spec=pltpu.PrefetchScalarGridSpec(
                    num_scalar_prefetch=0,
                    grid=(n_b, n_k),
                    in_specs=in_specs,
                    out_specs=pl.BlockSpec((tb, embed_dim), lambda i, k: (i, 0)),
                    scratch_shapes=[pltpu.VMEM((tb, hidden_dim), jnp.float32)],
                ),
                compiler_params=pltpu.CompilerParams(
                    dimension_semantics=("parallel", "arbitrary"),
                    vmem_limit_bytes=vmem_limit_bytes,
                ),
                cost_estimate=cost,
            )

        if _HAS_PIPELINE_MODE:
            try:
                out = build(True)(x_in, w1c, p1c, w2c, p2c)
            except (TypeError, NotImplementedError, pltpu.LoweringException):
                # Narrow fallback: build accepts pipeline_mode on BlockSpec but
                # rejects single-buffered constant blocks at lowering time.
                out = build(False)(x_in, w1c, p1c, w2c, p2c)
        else:
            out = build(False)(x_in, w1c, p1c, w2c, p2c)

        return out[:B]

    return forward


def init_params(key, input_dim, hidden_dim, embed_dim):
    """Deterministic synthetic parameters (shapes match nn.Linear / nn.LayerNorm).

    nn.Linear stores W as [out, in]; we keep the transposed [in, out] layout so the
    kernel computes x @ W on the MXU.  Per block, (bias, gamma, beta) are packed
    into a single [3, out] array (padded to 8 rows at prep time).
    """
    k1, k2, k3, k4 = jax.random.split(key, 4)
    w1 = jax.random.normal(k1, (input_dim, hidden_dim), jnp.float32) / jnp.sqrt(input_dim)
    b1 = jax.random.normal(k2, (hidden_dim,), jnp.float32) * 0.01
    p1 = jnp.stack([b1, jnp.ones((hidden_dim,), jnp.float32),
                    jnp.zeros((hidden_dim,), jnp.float32)], axis=0)
    w2 = jax.random.normal(k3, (hidden_dim, embed_dim), jnp.float32) / jnp.sqrt(hidden_dim)
    b2 = jax.random.normal(k4, (embed_dim,), jnp.float32) * 0.01
    p2 = jnp.stack([b2, jnp.ones((embed_dim,), jnp.float32),
                    jnp.zeros((embed_dim,), jnp.float32)], axis=0)
    return (w1, p1, w2, p2)


def reference_forward(x, params, compute_dtype=jnp.bfloat16):
    """Pure-JAX reference mirroring the kernel's bf16-MXU / f32-accumulate math."""
    w1, p1, w2, p2 = params
    h = jnp.dot(x.astype(compute_dtype), w1.astype(compute_dtype),
                preferred_element_type=jnp.float32) + p1[0:1, :]
    h = _layer_norm(h, p1[1:2, :], p1[2:3, :])
    h = jnp.maximum(h, 0.0)
    e = jnp.dot(h.astype(compute_dtype), w2.astype(compute_dtype),
                preferred_element_type=jnp.float32) + p2[0:1, :]
    e = _layer_norm(e, p2[1:2, :], p2[2:3, :])
    return jnp.maximum(e, 0.0)


if __name__ == "__main__":
    # Small shapes consistent with the module (input_dim >= hidden >= embed).
    # B=200 and INPUT_DIM=200 are deliberately not tile-aligned to exercise the
    # batch/K padding paths; max_tile_k=128 forces n_k=2 so the K-streamed
    # accumulator path is exercised too.
    B, INPUT_DIM, HIDDEN_DIM, EMBED_DIM = 200, 200, 128, 128

    key = jax.random.PRNGKey(0)
    kx, kp = jax.random.split(key)
    x = jax.random.normal(kx, (B, INPUT_DIM), jnp.float32)
    species = jnp.zeros((B,), jnp.int32)  # unused by forward, kept for parity
    params = init_params(kp, INPUT_DIM, HIDDEN_DIM, EMBED_DIM)

    forward = make_ortholog_encoder(params, max_tile_k=128)
    out = jax.block_until_ready(forward(x, species))

    ref = reference_forward(x, params)
    assert out.shape == (B, EMBED_DIM)
    assert jnp.allclose(out, ref, atol=1e-3, rtol=1e-3), "mismatch vs JAX reference"
    print("KERNEL_OK")
</pallas_src>

<mosaic_0001>
module attributes {stable_mosaic.version = 11 : i64} {
  func.func @ortholog_encoder_kernel(%arg0: i32, %arg1: i32, %arg2: memref<200x128xf32, #tpu.memory_space<vmem>>, %arg3: memref<128x128xbf16, #tpu.memory_space<vmem>>, %arg4: memref<8x128xf32, #tpu.memory_space<vmem>>, %arg5: memref<128x128xbf16, #tpu.memory_space<vmem>>, %arg6: memref<8x128xf32, #tpu.memory_space<vmem>>, %arg7: memref<200x128xf32, #tpu.memory_space<vmem>>, %arg8: memref<200x128xf32, #tpu.memory_space<vmem>>) attributes {dimension_semantics = [#tpu.dimension_semantics<parallel>, #tpu.dimension_semantics<arbitrary>], iteration_bounds = array<i64: 1, 2>, scalar_prefetch = 0 : i64, scratch_operands = 1 : i64, tpu.core_type = #tpu.core_type<tc>, window_params = [{transform_indices = @transform_0, window_bounds = array<i64: 200, 128>}, {transform_indices = @transform_1, window_bounds = array<i64: 128, 128>}, {pipeline_mode = #tpu.pipeline_mode<synchronous>, transform_indices = @transform_2, window_bounds = array<i64: 8, 128>}, {pipeline_mode = #tpu.pipeline_mode<synchronous>, transform_indices = @transform_3, window_bounds = array<i64: 128, 128>}, {pipeline_mode = #tpu.pipeline_mode<synchronous>, transform_indices = @transform_4, window_bounds = array<i64: 8, 128>}, {transform_indices = @transform_5, window_bounds = array<i64: 200, 128>}]} {
    %c0_i32 = arith.constant 0 : i32
    %0 = arith.cmpi eq, %arg1, %c0_i32 : i32
    %1 = arith.extui %0 : i1 to i32
    %c0_i32_0 = arith.constant 0 : i32
    %2 = arith.cmpi ne, %1, %c0_i32_0 : i32
    scf.if %2 {
      %cst_9 = arith.constant 0.000000e+00 : f32
      %13 = vector.broadcast %cst_9 : f32 to vector<200x128xf32>
      %c0_10 = arith.constant 0 : index
      %c0_11 = arith.constant 0 : index
      %14 = vector.load %arg8[%c0_10, %c0_11] : memref<200x128xf32, #tpu.memory_space<vmem>>, vector<200x128xf32>
      tpu.vector_store %arg8[%c0_10, %c0_11], %13 {strides = array<i32>} : memref<200x128xf32, #tpu.memory_space<vmem>>, vector<200x128xf32>,
    } else {
    }
    %c0 = arith.constant 0 : index
    %c0_1 = arith.constant 0 : index
    %3 = vector.load %arg8[%c0, %c0_1] : memref<200x128xf32, #tpu.memory_space<vmem>>, vector<200x128xf32>
    %c0_2 = arith.constant 0 : index
    %c0_3 = arith.constant 0 : index
    %4 = vector.load %arg2[%c0_2, %c0_3] : memref<200x128xf32, #tpu.memory_space<vmem>>, vector<200x128xf32>
    %5 = arith.truncf %4 : vector<200x128xf32> to vector<200x128xbf16>
    %c0_4 = arith.constant 0 : index
    %c0_5 = arith.constant 0 : index
    %6 = vector.load %arg3[%c0_4, %c0_5] : memref<128x128xbf16, #tpu.memory_space<vmem>>, vector<128x128xbf16>
    %cst = arith.constant dense<0.000000e+00> : vector<200x128xf32>
    %7 = tpu.matmul %5, %6, %cst {dimension_numbers = #tpu.dot_dimension_numbers<[1], [0], [0], [1], [0, 0, 1, 1], [], []>} : vector<200x128xbf16>, vector<128x128xbf16>, vector<200x128xf32> -> vector<200x128xf32>
    %8 = arith.addf %3, %7 : vector<200x128xf32>
    %c0_6 = arith.constant 0 : index
    %c0_7 = arith.constant 0 : index
    %9 = vector.load %arg8[%c0_6, %c0_7] : memref<200x128xf32, #tpu.memory_space<vmem>>, vector<200x128xf32>
    tpu.vector_store %arg8[%c0_6, %c0_7], %8 {strides = array<i32>} : memref<200x128xf32, #tpu.memory_space<vmem>>, vector<200x128xf32>,
    %c1_i32 = arith.constant 1 : i32
    %10 = arith.cmpi eq, %arg1, %c1_i32 : i32
    %11 = arith.extui %10 : i1 to i32
    %c0_i32_8 = arith.constant 0 : i32
    %12 = arith.cmpi ne, %11, %c0_i32_8 : i32
    scf.if %12 {
      %c0_9 = arith.constant 0 : index
      %c0_10 = arith.constant 0 : index
      %13 = vector.load %arg4[%c0_9, %c0_10] : memref<8x128xf32, #tpu.memory_space<vmem>>, vector<8x128xf32>
      %c0_11 = arith.constant 0 : index
      %c0_12 = arith.constant 0 : index
      %14 = vector.load %arg8[%c0_11, %c0_12] : memref<200x128xf32, #tpu.memory_space<vmem>>, vector<200x128xf32>
      %15 = vector.extract_strided_slice %13 {offsets = [0, 0], sizes = [1, 128], strides = [1, 1]} : vector<8x128xf32> to vector<1x128xf32>
      %16 = vector.broadcast %15 : vector<1x128xf32> to vector<200x128xf32>
      %17 = arith.addf %14, %16 : vector<200x128xf32>
      %18 = vector.extract_strided_slice %13 {offsets = [1, 0], sizes = [1, 128], strides = [1, 1]} : vector<8x128xf32> to vector<1x128xf32>
      %19 = vector.extract_strided_slice %13 {offsets = [2, 0], sizes = [1, 128], strides = [1, 1]} : vector<8x128xf32> to vector<1x128xf32>
      %cst_13 = arith.constant dense<0.000000e+00> : vector<200xf32>
      %20 = vector.multi_reduction <add>, %17, %cst_13 [1] : vector<200x128xf32> to vector<200xf32>
      %21 = vector.shape_cast %20 : vector<200xf32> to vector<200x1xf32>
      %cst_14 = arith.constant 1.280000e+02 : f32
      %22 = vector.broadcast %cst_14 : f32 to vector<200x1xf32>
      %23 = arith.divf %21, %22 : vector<200x1xf32>
      %24 = arith.mulf %17, %17 : vector<200x128xf32>
      %cst_15 = arith.constant dense<0.000000e+00> : vector<200xf32>
      %25 = vector.multi_reduction <add>, %24, %cst_15 [1] : vector<200x128xf32> to vector<200xf32>
      %26 = vector.shape_cast %25 : vector<200xf32> to vector<200x1xf32>
      %cst_16 = arith.constant 1.280000e+02 : f32
      %27 = vector.broadcast %cst_16 : f32 to vector<200x1xf32>
      %28 = arith.divf %26, %27 : vector<200x1xf32>
      %29 = arith.mulf %23, %23 : vector<200x1xf32>
      %30 = arith.subf %28, %29 : vector<200x1xf32>
      %cst_17 = arith.constant 0.000000e+00 : f32
      %31 = vector.broadcast %cst_17 : f32 to vector<200x1xf32>
      %32 = arith.maximumf %30, %31 : vector<200x1xf32>
      %33 = vector.broadcast %23 : vector<200x1xf32> to vector<200x128xf32>
      %34 = arith.subf %17, %33 : vector<200x128xf32>
      %cst_18 = arith.constant 9.99999974E-6 : f32
      %35 = vector.broadcast %cst_18 : f32 to vector<200x1xf32>
      %36 = arith.addf %32, %35 : vector<200x1xf32>
      %37 = math.rsqrt %36 : vector<200x1xf32>
      %38 = vector.broadcast %37 : vector<200x1xf32> to vector<200x128xf32>
      %39 = arith.mulf %34, %38 : vector<200x128xf32>
      %40 = vector.broadcast %18 : vector<1x128xf32> to vector<200x128xf32>
      %41 = arith.mulf %39, %40 : vector<200x128xf32>
      %42 = vector.broadcast %19 : vector<1x128xf32> to vector<200x128xf32>
      %43 = arith.addf %41, %42 : vector<200x128xf32>
      %cst_19 = arith.constant 0.000000e+00 : f32
      %44 = vector.broadcast %cst_19 : f32 to vector<200x128xf32>
      %45 = arith.maximumf %43, %44 : vector<200x128xf32>
      %c0_20 = arith.constant 0 : index
      %c0_21 = arith.constant 0 : index
      %46 = vector.load %arg6[%c0_20, %c0_21] : memref<8x128xf32, #tpu.memory_space<vmem>>, vector<8x128xf32>
      %47 = arith.truncf %45 : vector<200x128xf32> to vector<200x128xbf16>
      %c0_22 = arith.constant 0 : index
      %c0_23 = arith.constant 0 : index
      %48 = vector.load %arg5[%c0_22, %c0_23] : memref<128x128xbf16, #tpu.memory_space<vmem>>, vector<128x128xbf16>
      %cst_24 = arith.constant dense<0.000000e+00> : vector<200x128xf32>
      %49 = tpu.matmul %47, %48, %cst_24 {dimension_numbers = #tpu.dot_dimension_numbers<[1], [0], [0], [1], [0, 0, 1, 1], [], []>} : vector<200x128xbf16>, vector<128x128xbf16>, vector<200x128xf32> -> vector<200x128xf32>
      %50 = vector.extract_strided_slice %46 {offsets = [0, 0], sizes = [1, 128], strides = [1, 1]} : vector<8x128xf32> to vector<1x128xf32>
      %51 = vector.broadcast %50 : vector<1x128xf32> to vector<200x128xf32>
      %52 = arith.addf %49, %51 : vector<200x128xf32>
      %53 = vector.extract_strided_slice %46 {offsets = [1, 0], sizes = [1, 128], strides = [1, 1]} : vector<8x128xf32> to vector<1x128xf32>
      %54 = vector.extract_strided_slice %46 {offsets = [2, 0], sizes = [1, 128], strides = [1, 1]} : vector<8x128xf32> to vector<1x128xf32>
      %cst_25 = arith.constant dense<0.000000e+00> : vector<200xf32>
      %55 = vector.multi_reduction <add>, %52, %cst_25 [1] : vector<200x128xf32> to vector<200xf32>
      %56 = vector.shape_cast %55 : vector<200xf32> to vector<200x1xf32>
      %cst_26 = arith.constant 1.280000e+02 : f32
      %57 = vector.broadcast %cst_26 : f32 to vector<200x1xf32>
      %58 = arith.divf %56, %57 : vector<200x1xf32>
      %59 = arith.mulf %52, %52 : vector<200x128xf32>
      %cst_27 = arith.constant dense<0.000000e+00> : vector<200xf32>
      %60 = vector.multi_reduction <add>, %59, %cst_27 [1] : vector<200x128xf32> to vector<200xf32>
      %61 = vector.shape_cast %60 : vector<200xf32> to vector<200x1xf32>
      %cst_28 = arith.constant 1.280000e+02 : f32
      %62 = vector.broadcast %cst_28 : f32 to vector<200x1xf32>
      %63 = arith.divf %61, %62 : vector<200x1xf32>
      %64 = arith.mulf %58, %58 : vector<200x1xf32>
      %65 = arith.subf %63, %64 : vector<200x1xf32>
      %cst_29 = arith.constant 0.000000e+00 : f32
      %66 = vector.broadcast %cst_29 : f32 to vector<200x1xf32>
      %67 = arith.maximumf %65, %66 : vector<200x1xf32>
      %68 = vector.broadcast %58 : vector<200x1xf32> to vector<200x128xf32>
      %69 = arith.subf %52, %68 : vector<200x128xf32>
      %cst_30 = arith.constant 9.99999974E-6 : f32
      %70 = vector.broadcast %cst_30 : f32 to vector<200x1xf32>
      %71 = arith.addf %67, %70 : vector<200x1xf32>
      %72 = math.rsqrt %71 : vector<200x1xf32>
      %73 = vector.broadcast %72 : vector<200x1xf32> to vector<200x128xf32>
      %74 = arith.mulf %69, %73 : vector<200x128xf32>
      %75 = vector.broadcast %53 : vector<1x128xf32> to vector<200x128xf32>
      %76 = arith.mulf %74, %75 : vector<200x128xf32>
      %77 = vector.broadcast %54 : vector<1x128xf32> to vector<200x128xf32>
      %78 = arith.addf %76, %77 : vector<200x128xf32>
      %cst_31 = arith.constant 0.000000e+00 : f32
      %79 = vector.broadcast %cst_31 : f32 to vector<200x128xf32>
      %80 = arith.maximumf %78, %79 : vector<200x128xf32>
      %c0_32 = arith.constant 0 : index
      %c0_33 = arith.constant 0 : index
      %81 = vector.load %arg7[%c0_32, %c0_33] : memref<200x128xf32, #tpu.memory_space<vmem>>, vector<200x128xf32>
      tpu.vector_store %arg7[%c0_32, %c0_33], %80 {strides = array<i32>} : memref<200x128xf32, #tpu.memory_space<vmem>>, vector<200x128xf32>,
    } else {
    }
    return
  }
  func.func @transform_0(%arg0: i32, %arg1: i32) -> (i32, i32) {
    %c0_i32 = arith.constant 0 : i32
    return %arg0, %arg1 : i32, i32
  }
  func.func @transform_1(%arg0: i32, %arg1: i32) -> (i32, i32) {
    %c0_i32 = arith.constant 0 : i32
    %c0_i32_0 = arith.constant 0 : i32
    return %arg1, %c0_i32 : i32, i32
  }
  func.func @transform_2(%arg0: i32, %arg1: i32) -> (i32, i32) {
    %c0_i32 = arith.constant 0 : i32
    %c0_i32_0 = arith.constant 0 : i32
    %c0_i32_1 = arith.constant 0 : i32
    return %c0_i32, %c0_i32_0 : i32, i32
  }
  func.func @transform_3(%arg0: i32, %arg1: i32) -> (i32, i32) {
    %c0_i32 = arith.constant 0 : i32
    %c0_i32_0 = arith.constant 0 : i32
    %c0_i32_1 = arith.constant 0 : i32
    return %c0_i32, %c0_i32_0 : i32, i32
  }
  func.func @transform_4(%arg0: i32, %arg1: i32) -> (i32, i32) {
    %c0_i32 = arith.constant 0 : i32
    %c0_i32_0 = arith.constant 0 : i32
    %c0_i32_1 = arith.constant 0 : i32
    return %c0_i32, %c0_i32_0 : i32, i32
  }
  func.func @transform_5(%arg0: i32, %arg1: i32) -> (i32, i32) {
    %c0_i32 = arith.constant 0 : i32
    %c0_i32_0 = arith.constant 0 : i32
    return %arg0, %c0_i32 : i32, i32
  }
}

</mosaic_0001>

<bundles_post_ra>
// kernel: tpu_custom_call.1
= control target key start
LH: loop header
LB: loop body
LE: loop exit
PB: predicated region body
PF: predicated region fallthrough
CT: control target
= control target key end

     0   :  { %s4561_s0 = inlined_call_operand.hbm [shape: f32[200,256], index: 0, kind: input, shape index: {}]   ;;  %s4562_s1 = inlined_call_operand.hbm [shape: bf16[256,128], index: 1, kind: input, shape index: {}]   ;;  %s4563_s2 = inlined_call_operand.hbm [shape: f32[8,128], index: 2, kind: input, shape index: {}]   ;;  %s4564_s3 = inlined_call_operand.hbm [shape: bf16[128,128], index: 3, kind: input, shape index: {}]   ;;  %s4565_s4 = inlined_call_operand.hbm [shape: f32[8,128], index: 4, kind: input, shape index: {}]   ;;  %s4566_s5 = inlined_call_operand.hbm [shape: f32[200,128], index: 5, kind: output, shape index: {}]  }
   0x1   :  { %4570 = sst [smem:[#allocation19_spill]] %s4561_s0 }
   0x2   :  { %4571 = sst [smem:[#allocation20_spill]] %s4563_s2 }
   0x3   :  { %4572 = sst [smem:[#allocation21_spill]] %s4564_s3 }
   0x4   :  { %4573 = sst [smem:[#allocation22_spill]] %s4565_s4 }
   0x5   :  { %10 = vsyncpa [#allocation4], 0 }
   0x6   :  { %12 = vsyncpa [#allocation4 + $0x1], 0 }
   0x7   :  { %13 = vsyncpa [#allocation7], 0 }
   0x8   :  { %15 = vsyncpa [#allocation7 + $0x1], 0 }
   0x9   :  { %16 = vsyncpa [#allocation10], 0 }
   0xa   :  { %17 = vsyncpa [#allocation5], 0  ;;  %s2945_s18 = smov 0   ;;  %s2947_s19 = smov 0  }
   0xb   :  { %s2949_s20 = smov 0   ;;  %s2951_s21 = smov 0  }
   0xc   :  { %s2953_s22 = smov 0   ;;  %s2955_s23 = smov 0  }
   0xd LB: > { %s2974_s24 = sadd.s32 4294967295, %s2900_s23   ;;  %s44_s25 = sadd.s32 1, %s2888_s20  ;;  %s2900_s23 = sphi %s2955_s23, %s23_s23   ;;  %s2896_s22 = sphi %s2953_s22, %s4634_s22   ;;  %s2892_s21 = sphi %s2951_s21, %s4633_s21   ;;  %s2888_s20 = sphi %s2949_s20, %s4632_s20   ;;  %s2884_s19 = sphi %s2947_s19, %s4631_s19   ;;  %s2880_s18 = sphi %s2945_s18, %s4630_s18  }
   0xe   : > { %p51_p0 = scmp.ne.s32.totalorder %s2888_s20, %s2884_s19  ;;  %p52_p1 = scmp.eq.s32.totalorder %s2900_s23, 0 }
   0xf   : > { %p57_p2 = scmp.ne.s32.totalorder %s2884_s19, %s2880_s18  ;;  %p58_p3 = scmp.eq.s32.totalorder %s2974_s24, 0 }
  0x10   : > { %p2982_p4 = por %p52_p1, %p51_p0  ;;  %p2296_p5 = scmp.ge.s32.totalorder %s2900_s23, 1 }
  0x11   : > { %p2989_p6 = por %p58_p3, %p57_p2  ;;  %p183_p7 = scmp.lt.s32.totalorder %s2900_s23, 3 }
  0x12   : > { %s4576_s2 = sld [smem:[#allocation20_spill]]  ;;  %s2902_s7 = smov [#allocation8]  }
  0x13   : > { %p2997_p8 = pnand %p2296_p5, %p183_p7  ;;  %s197_s8 = sshll.u32 %s2902_s7, 4  ;;  %s198_s8 = int_to_ptr.vmem [resolvable:$true] %s197_s8 }
  0x14   : > { %p2487_p10 = scmp.lt.s32.totalorder %s2900_s23, 2  ;;  %s4579_s3 = sld [smem:[#allocation21_spill]] }
  0x15   : > { %p2467_p9 = pneg %p2997_p8  ;;  %s2903_s14 = smov [#allocation9]  }
  0x16   : > { %p3015_p12 = pnand %p2487_p10, %p2982_p4  ;;  %s208_s15 = sshll.u32 %s2903_s14, 4  ;;  %s209_s15 = int_to_ptr.vmem [resolvable:$true] %s208_s15 }
  0x17   : > { %p3006_p11 = pnand %p2467_p9, %p58_p3  ;;  %s4581_s4 = sld [smem:[#allocation22_spill]] }
  0x18   : > { %s195_s30 = sshll.u32 %s4576_s2, 4  ;;  %s4567_s28 = smov 64   ;;  %s196_s30 = int_to_ptr.hbm [resolvable:$true] %s195_s30 }
  0x19   : > { %2470 = dma.hbm_to_vmem [thread:$0]  (!%p3006_p11), %s196_s30, 128, %s198_s8, [#allocation7]  }
  0x1a   : > { %s206_s12 = sshll.u32 %s4579_s3, 4  ;;  %s4568_s26 = smov 4   ;;  %s207_s12 = int_to_ptr.hbm [resolvable:$true] %s206_s12 }
  0x1b   : > { %2473 = dma.hbm_to_vmem [thread:$0]  (!%p3006_p11), %s207_s12, 1024, %s209_s15, [#allocation10], %s4567_s28, %s4567_s28, %s4568_s26  }
  0x1c   : > { %s2906_s29 = smov [#allocation11]   ;;  %s32_s30 = sadd.s32 1, %s2896_s22 }
  0x1d   : > { %s221_s18 = sshll.u32 %s4581_s4, 4  ;;  %s223_s7 = sshll.u32 %s2906_s29, 4  ;;  %s222_s18 = int_to_ptr.hbm [resolvable:$true] %s221_s18  ;;  %s224_s7 = int_to_ptr.vmem [resolvable:$true] %s223_s7 }
  0x1e   : > { %2476 = dma.hbm_to_vmem [thread:$0]  (!%p3006_p11), %s222_s18, 128, %s224_s7, [#allocation10]  }
  0x1f   : > { %s234_s8 = sand.u32 1, %s2888_s20   ;;  %p33_p13 = scmp.ge.s32.totalorder %s32_s30, 2 }
  0x20   : > { %s2445_s10 = smul.u32 200, %s234_s8  ;;  %s2301_s11 = sshll.u32 %s2896_s22, 3 }
  0x21   : > { %s4636_s30 = smov (%p33_p13, %s32_s30), 0  ;;  %s4583_s0 = sld [smem:[#allocation19_spill]] }
  0x22   : > { %4582 = sst [smem:[#allocation18_spill]] %s4636_s30  ;;  %s40_s15 = ssub.s32 %s2896_s22, %s4636_s30 }
  0x23   : > { %p42_p0 = scmp.eq.s32.totalorder %s40_s15, 0  ;;  %s238_s9 = scalar_lea.vmem [#allocation3], %s2445_s10 }
  0x24   : > { %s248_s18 = sshll.u32 %s238_s9, 4  ;;  %s258_s7 = sand.u32 1, %s2900_s23   ;;  %s249_s18 = int_to_ptr.vmem [resolvable:$true] %s248_s18 }
  0x25   : > { %s3044_s29 = scalar_select %p42_p0, %s2888_s20, %s44_s25  }
  0x26   : > { %s235_s28 = scalar_lea.sflag [#allocation4], %s234_s8  ;;  %s2907_s26 = smov 256  }
  0x27   : > { %s245_s12 = scalar_lea.hbm %s4583_s0, %s2301_s11  ;;  %s2908_s2 = smov 128  }
  0x28   : > { %s246_s17 = sshll.u32 %s245_s12, 4  ;;  %s2909_s3 = smov 8   ;;  %s247_s17 = int_to_ptr.hbm [resolvable:$true] %s246_s17 }
  0x29   : > { %2480 = dma.hbm_to_vmem [thread:$0]  (!%p3015_p12), %s247_s17, 3200, %s249_s18, %s235_s28, %s2907_s26, %s2908_s2, %s2909_s3  }
  0x2a   : > { %s2302_s11 = sshll.u32 %s234_s8, 6  ;;  %s2380_s14 = sshll.u32 %s2896_s22, 6 }
  0x2b   : > { %s267_s15 = scalar_lea.hbm %s4562_s1, %s2380_s14  ;;  %s262_s10 = scalar_lea.vmem [#allocation6], %s2302_s11 }
  0x2c   : > { %s270_s9 = sshll.u32 %s262_s10, 4  ;;  %s268_s0 = sshll.u32 %s267_s15, 4  ;;  %s271_s9 = int_to_ptr.vmem [resolvable:$true] %s270_s9  ;;  %s269_s0 = int_to_ptr.hbm [resolvable:$true] %s268_s0 }
  0x2d   : > { %s259_s25 = scalar_lea.sflag [#allocation7], %s258_s7  ;;  %s4584_s4 = smov 4  }
  0x2e   : > { %s4585_s30 = smov 64   ;;  %282 = sbr.rel (%p2997_p8) target bundleno = 942 (0x3ae), region = 40 }
  0x2f   : > { %2483 = dma.hbm_to_vmem [thread:$0]  (!%p3015_p12), %s269_s0, 1024, %s271_s9, %s259_s25, %s4585_s30, %s4585_s30, %s4584_s4  }
  0x30   : > { %s284_s2 = sand.u32 (!%p2997_p8), 1, %s2884_s19  }
  0x31   : > { %s2446_s3 = smul.u32 (!%p2997_p8), 200, %s284_s2  ;;  %s285_s28 = scalar_lea.sflag (!%p2997_p8), [#allocation4], %s284_s2 }
  0x33   : > { %s3061_s26 = scalar_lea.vmem [#allocation3], %s2446_s3 }
  0x34   : > { %2859 = dma.done.wait (%p2989_p6), %s285_s28, 3200  }
  0x35   : > { %2861 = vsyncadd (%p2989_p6), %s285_s28, 4294964096  ;;  %s294_s13 = sand.u32 1, %s2974_s24   ;;  %s2306_s8 = sshll.u32 %s284_s2, 6 }
  0x36   : > { %s295_s0 = scalar_lea.sflag [#allocation7], %s294_s13  ;;  %s3068_s4 = scalar_lea.vmem [#allocation6], %s2306_s8 }
  0x37   : > { %2863 = dma.done.wait (%p2989_p6), %s295_s0, 1024  }
  0x38   : > { %2865 = vsyncadd (%p2989_p6), %s295_s0, 4294966272 }
  0x39   : > { %2867 = dma.done.wait (%p58_p3), [#allocation7], 128  }
  0x3a   : > { %2869 = vsyncadd (%p58_p3), [#allocation7], 4294967168 }
  0x3b   : > { %2871 = dma.done.wait (%p58_p3), [#allocation10], 1152  }
  0x3c   : > { %2873 = vsyncadd (%p58_p3), [#allocation10], 4294966144  ;;  %p2310_p1 = scmp.ne.s32.totalorder %s2892_s21, 0 }
  0x3e   : > { %347 = sbr.rel (%p2310_p1) target bundleno = 93 (0x5d), region = 64 }
  0x43   : > { %v2910_v0 = vmov 0.0  }
  0x44   : > { %348 = vst [vmem:[#allocation2 + $0xb0] sm:$0xff] %v2910_v0 }
  0x45   : > { %349 = vst [vmem:[#allocation2] sm:$0xff] %v2910_v0 }
  0x46   : > { %350 = vst [vmem:[#allocation2 + $0x10] sm:$0xff] %v2910_v0 }
  0x47   : > { %351 = vst [vmem:[#allocation2 + $0x48] sm:$0xff] %v2910_v0 }
  0x48   : > { %352 = vst [vmem:[#allocation2 + $0x60] sm:$0xff] %v2910_v0 }
  0x49   : > { %353 = vst [vmem:[#allocation2 + $0x28] sm:$0xff] %v2910_v0 }
  0x4a   : > { %354 = vst [vmem:[#allocation2 + $0x40] sm:$0xff] %v2910_v0 }
  0x4b   : > { %355 = vst [vmem:[#allocation2 + $0x78] sm:$0xff] %v2910_v0 }
  0x4c   : > { %356 = vst [vmem:[#allocation2 + $0x80] sm:$0xff] %v2910_v0 }
  0x4d   : > { %357 = vst [vmem:[#allocation2 + $0x88] sm:$0xff] %v2910_v0 }
  0x4e   : > { %358 = vst [vmem:[#allocation2 + $0xb8] sm:$0xff] %v2910_v0 }
  0x4f   : > { %359 = vst [vmem:[#allocation2 + $0x70] sm:$0xff] %v2910_v0 }
  0x50   : > { %360 = vst [vmem:[#allocation2 + $0x18] sm:$0xff] %v2910_v0 }
  0x51   : > { %361 = vst [vmem:[#allocation2 + $0x68] sm:$0xff] %v2910_v0 }
  0x52   : > { %362 = vst [vmem:[#allocation2 + $0x98] sm:$0xff] %v2910_v0 }
  0x53   : > { %363 = vst [vmem:[#allocation2 + $0xa0] sm:$0xff] %v2910_v0 }
  0x54   : > { %364 = vst [vmem:[#allocation2 + $0x20] sm:$0xff] %v2910_v0 }
  0x55   : > { %365 = vst [vmem:[#allocation2 + $0x30] sm:$0xff] %v2910_v0 }
  0x56   : > { %366 = vst [vmem:[#allocation2 + $0x90] sm:$0xff] %v2910_v0 }
  0x57   : > { %367 = vst [vmem:[#allocation2 + $0x38] sm:$0xff] %v2910_v0 }
  0x58   : > { %368 = vst [vmem:[#allocation2 + $0x58] sm:$0xff] %v2910_v0 }
  0x59   : > { %369 = vst [vmem:[#allocation2 + $0x50] sm:$0xff] %v2910_v0 }
  0x5a   : > { %370 = vst [vmem:[#allocation2 + $0x8] sm:$0xff] %v2910_v0 }
  0x5b   : > { %371 = vst [vmem:[#allocation2 + $0xa8] sm:$0xff] %v2910_v0 }
  0x5c   : > { %372 = vst [vmem:[#allocation2 + $0xc0] sm:$0xff] %v2910_v0 }
  0x5d PF: > { %v2388_v1 = vld [vmem:[%s3068_s4 + $0x38] sm:$0xff]  ;;  %v2387_v2 = vld [vmem:[%s3068_s4 + $0x30] sm:$0xff]  ;;  %v2386_v3 = vld [vmem:[%s3068_s4 + $0x28] sm:$0xff]  ;;  %p2343_p2 = scmp.ne.s32.totalorder %s2892_s21, 1 }
  0x5e   : > { %2398 = vmatpush.bf16.msra.mxu2 %v2388_v1  ;;  %2399 = vmatpush.bf16.msra.mxu3 %v2388_v1  ;;  %v2385_v4 = vld [vmem:[%s3068_s4 + $0x20] sm:$0xff]  ;;  %v2384_v5 = vld [vmem:[%s3068_s4 + $0x18] sm:$0xff]  ;;  %v2383_v6 = vld [vmem:[%s3068_s4 + $0x10] sm:$0xff] }
  0x5f   : > { %500 = vmatpush.bf16.msra.mxu0 %v2388_v1  ;;  %2397 = vmatpush.bf16.msra.mxu1 %v2388_v1  ;;  %v2382_v7 = vld [vmem:[%s3068_s4 + $0x8] sm:$0xff]  ;;  %v2381_v8 = vld [vmem:[%s3068_s4] sm:$0xff]  ;;  %v410_v9 = vld [vmem:[%s3061_s26 + $0x60] sm:$0xff] }
  0x60   : > { %v411_v10 = vld [vmem:[%s3061_s26 + $0x68] sm:$0xff]  ;;  %v418_v11 = vld [vmem:[%s3061_s26 + $0xa0] sm:$0xff]  ;;  %v404_v15 = vld [vmem:[%s3061_s26 + $0x30] sm:$0xff] }
  0x61   : > { %v419_v12 = vld [vmem:[%s3061_s26 + $0xa8] sm:$0xff]  ;;  %v398_v13 = vld [vmem:[%s3061_s26] sm:$0xff]  ;;  %v405_v16 = vld [vmem:[%s3061_s26 + $0x38] sm:$0xff]  ;;  %v429_v17 = vpack.c.bf16 %v411_v10, %v410_v9 }
  0x62   : > { %2401 = vmatpush.bf16.msra.mxu2 %v2387_v2  ;;  %2402 = vmatpush.bf16.msra.mxu3 %v2387_v2  ;;  %v399_v14 = vld [vmem:[%s3061_s26 + $0x8] sm:$0xff]  ;;  %v433_v18 = vpack.c.bf16 %v419_v12, %v418_v11  ;;  %v426_v20 = vpack.c.bf16 %v405_v16, %v404_v15  ;;  %v412_v21 = vld [vmem:[%s3061_s26 + $0x70] sm:$0xff]  ;;  %v413_v22 = vld [vmem:[%s3061_s26 + $0x78] sm:$0xff] }
  0x63   : > { %501 = vmatpush.bf16.msra.mxu0 %v2387_v2  ;;  %2400 = vmatpush.bf16.msra.mxu1 %v2387_v2  ;;  %v423_v19 = vpack.c.bf16 %v399_v14, %v398_v13  ;;  %v420_v23 = vld [vmem:[%s3061_s26 + $0xb0] sm:$0xff]  ;;  %v421_v24 = vld [vmem:[%s3061_s26 + $0xb8] sm:$0xff]  ;;  %v406_v27 = vld [vmem:[%s3061_s26 + $0x40] sm:$0xff]  ;;  %v430_v29 = vpack.c.bf16 %v413_v22, %v412_v21 }
  0x64   : > { %v400_v25 = vld [vmem:[%s3061_s26 + $0x10] sm:$0xff]  ;;  %v401_v26 = vld [vmem:[%s3061_s26 + $0x18] sm:$0xff]  ;;  %v407_v28 = vld [vmem:[%s3061_s26 + $0x48] sm:$0xff]  ;;  %v434_v30 = vpack.c.bf16 %v421_v24, %v420_v23 }
  0x65   : > { %v424_v31 = vpack.c.bf16 %v401_v26, %v400_v25  ;;  %v427_v32 = vpack.c.bf16 %v407_v28, %v406_v27  ;;  %v414_v33 = vld [vmem:[%s3061_s26 + $0x80] sm:$0xff]  ;;  %v415_v34 = vld [vmem:[%s3061_s26 + $0x88] sm:$0xff]  ;;  %v408_v38 = vld [vmem:[%s3061_s26 + $0x50] sm:$0xff] }
  0x66   : > { %2404 = vmatpush.bf16.msra.mxu2 %v2386_v3  ;;  %2405 = vmatpush.bf16.msra.mxu3 %v2386_v3  ;;  %v422_v35 = vld [vmem:[%s3061_s26 + $0xc0] sm:$0xff]  ;;  %v403_v37 = vld [vmem:[%s3061_s26 + $0x28] sm:$0xff]  ;;  %v409_v39 = vld [vmem:[%s3061_s26 + $0x58] sm:$0xff]  ;;  %v431_v40 = vpack.c.bf16 %v415_v34, %v414_v33 }
  0x67   : > { %502 = vmatpush.bf16.msra.mxu0 %v2386_v3  ;;  %2403 = vmatpush.bf16.msra.mxu1 %v2386_v3  ;;  %v402_v36 = vld [vmem:[%s3061_s26 + $0x20] sm:$0xff]  ;;  %v435_v41 = vpack.c.bf16 %v422_v35, %v422_v35  ;;  %v428_v43 = vpack.c.bf16 %v409_v39, %v408_v38  ;;  %v416_v44 = vld [vmem:[%s3061_s26 + $0x90] sm:$0xff]  ;;  %v417_v45 = vld [vmem:[%s3061_s26 + $0x98] sm:$0xff] }
  0x68   : > { %v425_v42 = vpack.c.bf16 %v403_v37, %v402_v36  ;;  %v432_v46 = vpack.c.bf16 %v417_v45, %v416_v44  ;;  %v373_v47 = vld [vmem:[#allocation2 + $0xb0] sm:$0xff]  ;;  %v379_v48 = vld [vmem:[#allocation2 + $0x40] sm:$0xff]  ;;  %v385_v53 = vld [vmem:[#allocation2 + $0x18] sm:$0xff] }
  0x69   : > { %v393_v54 = vld [vmem:[#allocation2 + $0x58] sm:$0xff]  ;;  %v374_v59 = vld [vmem:[#allocation2] sm:$0xff]  ;;  %v386_v1 = vld [vmem:[#allocation2 + $0x68] sm:$0xff] }
  0x6a   : > { %2407 = vmatpush.bf16.msra.mxu2 %v2385_v4  ;;  %2408 = vmatpush.bf16.msra.mxu3 %v2385_v4  ;;  %v380_v60 = vld [vmem:[#allocation2 + $0x78] sm:$0xff]  ;;  %v394_v2 = vld [vmem:[#allocation2 + $0x50] sm:$0xff]  ;;  %v395_v14 = vld [vmem:[#allocation2 + $0x8] sm:$0xff] }
  0x6b   : > { %503 = vmatpush.bf16.msra.mxu0 %v2385_v4  ;;  %2406 = vmatpush.bf16.msra.mxu1 %v2385_v4  ;;  %v387_v13 = vld [vmem:[#allocation2 + $0x98] sm:$0xff]  ;;  %v388_v25 = vld [vmem:[#allocation2 + $0xa0] sm:$0xff]  ;;  %v396_v26 = vld [vmem:[#allocation2 + $0xa8] sm:$0xff] }
  0x6c   : > { %v389_v37 = vld [vmem:[#allocation2 + $0x20] sm:$0xff]  ;;  %v384_v44 = vld [vmem:[#allocation2 + $0x70] sm:$0xff] }
  0x6d   : > { %v397_v38 = vld [vmem:[#allocation2 + $0xc0] sm:$0xff] }
  0x6e   : > { %2410 = vmatpush.bf16.msra.mxu2 %v2384_v5  ;;  %2411 = vmatpush.bf16.msra.mxu3 %v2384_v5 }
  0x6f   : > { %504 = vmatpush.bf16.msra.mxu0 %v2384_v5  ;;  %2409 = vmatpush.bf16.msra.mxu1 %v2384_v5 }
  0x72   : > { %2413 = vmatpush.bf16.msra.mxu2 %v2383_v6  ;;  %2414 = vmatpush.bf16.msra.mxu3 %v2383_v6 }
  0x73   : > { %505 = vmatpush.bf16.msra.mxu0 %v2383_v6  ;;  %2412 = vmatpush.bf16.msra.mxu1 %v2383_v6 }
  0x76   : > { %2416 = vmatpush.bf16.msra.mxu2 %v2382_v7  ;;  %2417 = vmatpush.bf16.msra.mxu3 %v2382_v7 }
  0x77   : > { %506 = vmatpush.bf16.msra.mxu0 %v2382_v7  ;;  %2415 = vmatpush.bf16.msra.mxu1 %v2382_v7  ;;  %v375_v7 = vld [vmem:[#allocation2 + $0x10] sm:$0xff] }
  0x7a   : > { %2419 = vmatpush.bf16.msra.mxu2 %v2381_v8  ;;  %2420 = vmatpush.bf16.msra.mxu3 %v2381_v8 }
  0x7b   : > { %507 = vmatpush.bf16.msra.mxu0 %v2381_v8  ;;  %2418 = vmatpush.bf16.msra.mxu1 %v2381_v8  ;;  %v381_v8 = vld [vmem:[#allocation2 + $0x80] sm:$0xff] }
  0x7d   : > { %538 = vmatmul.bf16.vlgmr.msra.gmra.mxu2 %v429_v17  ;;  %558 = vmatmul.bf16.vlgmr.msra.gmra.mxu3 %v433_v18 }
  0x7e   : > { %508 = vmatmul.bf16.vlgmr.msra.gmra.mxu0 %v423_v19  ;;  %523 = vmatmul.bf16.vlgmr.msra.gmra.mxu1 %v426_v20  ;;  %v376_v19 = vld [vmem:[#allocation2 + $0x48] sm:$0xff] }
  0x7f   : > { %v382_v20 = vld [vmem:[#allocation2 + $0x88] sm:$0xff] }
  0x8d   : > { %543 = vmatmul.bf16.gmra.mxu2 %v430_v29  ;;  %563 = vmatmul.bf16.gmra.mxu3 %v434_v30 }
  0x8e   : > { %513 = vmatmul.bf16.gmra.mxu0 %v424_v31  ;;  %528 = vmatmul.bf16.gmra.mxu1 %v427_v32  ;;  %v377_v31 = vld [vmem:[#allocation2 + $0x60] sm:$0xff]  ;;  %v383_v32 = vld [vmem:[#allocation2 + $0xb8] sm:$0xff] }
  0x9d   : > { %548 = vmatmul.bf16.gmra.mxu2 %v431_v40  ;;  %568 = vmatmul.bf16.gmra.mxu3 %v435_v41 }
  0x9e   : > { %518 = vmatmul.bf16.gmra.mxu0 %v425_v42  ;;  %533 = vmatmul.bf16.gmra.mxu1 %v428_v43  ;;  %v378_v43 = vld [vmem:[#allocation2 + $0x28] sm:$0xff] }
  0xad   : > { %553 = vmatmul.bf16.gmra.mxu2 %v432_v46 }
  0xfb   : > { %v509_v49 = vpop.f32.mrf.mxu0  ;;  %v524_v50 = vpop.f32.mrf.mxu1 }
  0xfc   : > { %v573_v51 = vadd.f32 %v509_v49, %v373_v47  ;;  %v579_v52 = vadd.f32 %v524_v50, %v379_v48  ;;  %v390_v49 = vld [vmem:[#allocation2 + $0x30] sm:$0xff] }
  0xfe   : > { %598 = vst [vmem:[#allocation2 + $0xb0] sm:$0xff] %v573_v51 }
  0xff   : > { %604 = vst [vmem:[#allocation2 + $0x40] sm:$0xff] %v579_v52 }
 0x100   : > { %v539_v55 = vpop.f32.mrf.mxu2  ;;  %v559_v56 = vpop.f32.mrf.mxu3 }
 0x101   : > { %v585_v57 = vadd.f32 %v539_v55, %v385_v53  ;;  %v593_v58 = vadd.f32 %v559_v56, %v393_v54  ;;  %v391_v53 = vld [vmem:[#allocation2 + $0x90] sm:$0xff]  ;;  %v392_v56 = vld [vmem:[#allocation2 + $0x38] sm:$0xff] }
 0x103   : > { %610 = vst [vmem:[#allocation2 + $0x18] sm:$0xff] %v585_v57  ;;  %v511_v61 = vpop.f32.mrf.mxu0  ;;  %v526_v62 = vpop.f32.mrf.mxu1 }
 0x104   : > { %618 = vst [vmem:[#allocation2 + $0x58] sm:$0xff] %v593_v58  ;;  %v574_v63 = vadd.f32 %v511_v61, %v374_v59  ;;  %v580_v0 = vadd.f32 %v526_v62, %v380_v60 }
 0x106   : > { %599 = vst [vmem:[#allocation2] sm:$0xff] %v574_v63 }
 0x107   : > { %605 = vst [vmem:[#allocation2 + $0x78] sm:$0xff] %v580_v0 }
 0x108   : > { %v541_v3 = vpop.f32.mrf.mxu2  ;;  %v561_v4 = vpop.f32.mrf.mxu3 }
 0x109   : > { %v586_v5 = vadd.f32 %v541_v3, %v386_v1  ;;  %v594_v6 = vadd.f32 %v561_v4, %v394_v2 }
 0x10b   : > { %611 = vst [vmem:[#allocation2 + $0x68] sm:$0xff] %v586_v5  ;;  %v514_v9 = vpop.f32.mrf.mxu0  ;;  %v529_v10 = vpop.f32.mrf.mxu1 }
 0x10c   : > { %619 = vst [vmem:[#allocation2 + $0x50] sm:$0xff] %v594_v6  ;;  %v575_v11 = vadd.f32 %v514_v9, %v375_v7  ;;  %v581_v12 = vadd.f32 %v529_v10, %v381_v8 }
 0x10e   : > { %600 = vst [vmem:[#allocation2 + $0x10] sm:$0xff] %v575_v11 }
 0x10f   : > { %606 = vst [vmem:[#allocation2 + $0x80] sm:$0xff] %v581_v12 }
 0x110   : > { %v544_v15 = vpop.f32.mrf.mxu2  ;;  %v564_v16 = vpop.f32.mrf.mxu3 }
 0x111   : > { %v587_v17 = vadd.f32 %v544_v15, %v387_v13  ;;  %v595_v18 = vadd.f32 %v564_v16, %v395_v14 }
 0x113   : > { %612 = vst [vmem:[#allocation2 + $0x98] sm:$0xff] %v587_v17  ;;  %v516_v21 = vpop.f32.mrf.mxu0  ;;  %v531_v22 = vpop.f32.mrf.mxu1 }
 0x114   : > { %620 = vst [vmem:[#allocation2 + $0x8] sm:$0xff] %v595_v18  ;;  %v576_v23 = vadd.f32 %v516_v21, %v376_v19  ;;  %v582_v24 = vadd.f32 %v531_v22, %v382_v20 }
 0x116   : > { %601 = vst [vmem:[#allocation2 + $0x48] sm:$0xff] %v576_v23 }
 0x117   : > { %607 = vst [vmem:[#allocation2 + $0x88] sm:$0xff] %v582_v24 }
 0x118   : > { %v546_v27 = vpop.f32.mrf.mxu2  ;;  %v566_v28 = vpop.f32.mrf.mxu3 }
 0x119   : > { %v588_v29 = vadd.f32 %v546_v27, %v388_v25  ;;  %v596_v30 = vadd.f32 %v566_v28, %v396_v26 }
 0x11b   : > { %613 = vst [vmem:[#allocation2 + $0xa0] sm:$0xff] %v588_v29  ;;  %v519_v33 = vpop.f32.mrf.mxu0  ;;  %v534_v34 = vpop.f32.mrf.mxu1 }
 0x11c   : > { %621 = vst [vmem:[#allocation2 + $0xa8] sm:$0xff] %v596_v30  ;;  %v577_v35 = vadd.f32 %v519_v33, %v377_v31  ;;  %v583_v36 = vadd.f32 %v534_v34, %v383_v32 }
 0x11e   : > { %602 = vst [vmem:[#allocation2 + $0x60] sm:$0xff] %v577_v35 }
 0x11f   : > { %608 = vst [vmem:[#allocation2 + $0xb8] sm:$0xff] %v583_v36 }
 0x120   : > { %v549_v39 = vpop.f32.mrf.mxu2  ;;  %v569_v40 = vpop.f32.mrf.mxu3 }
 0x121   : > { %v589_v41 = vadd.f32 %v549_v39, %v389_v37  ;;  %v597_v42 = vadd.f32 %v569_v40, %v397_v38 }
 0x123   : > { %614 = vst [vmem:[#allocation2 + $0x20] sm:$0xff] %v589_v41  ;;  %v521_v45 = vpop.f32.mrf.mxu0  ;;  %v536_v46 = vpop.f32.mrf.mxu1 }
 0x124   : > { %622 = vst [vmem:[#allocation2 + $0xc0] sm:$0xff] %v597_v42  ;;  %v578_v47 = vadd.f32 %v521_v45, %v378_v43  ;;  %v584_v48 = vadd.f32 %v536_v46, %v384_v44 }
 0x126   : > { %603 = vst [vmem:[#allocation2 + $0x28] sm:$0xff] %v578_v47 }
 0x127   : > { %609 = vst [vmem:[#allocation2 + $0x70] sm:$0xff] %v584_v48 }
 0x128   : > { %v551_v50 = vpop.f32.mrf.mxu2  ;;  %v571_v51 = vpop.f32.mrf.mxu3 }
 0x129   : > { %v590_v52 = vadd.f32 %v551_v50, %v390_v49 }
 0x12b   : > { %615 = vst [vmem:[#allocation2 + $0x30] sm:$0xff] %v590_v52 }
 0x130   : > { %v554_v54 = vpop.f32.mrf.mxu2 }
 0x131   : > { %v591_v55 = vadd.f32 %v554_v54, %v391_v53 }
 0x133   : > { %616 = vst [vmem:[#allocation2 + $0x90] sm:$0xff] %v591_v55 }
 0x137   : > { %626 = sbr.rel (%p2343_p2) target bundleno = 936 (0x3a8), region = 68 }
 0x138   : > { %v556_v57 = vpop.f32.mrf.mxu2 }
 0x139   : > { %v592_v58 = vadd.f32 %v556_v57, %v392_v56 }
 0x13b   : > { %617 = vst [vmem:[#allocation2 + $0x38] sm:$0xff] %v592_v58 }
 0x13c   : > { %v3117_v59 = vld [vmem:[#allocation8] sm:$0xff]  ;;  %v641_v1 = vld [vmem:[#allocation2 + $0x68] sm:$0xff]  ;;  %v643_v3 = vld [vmem:[#allocation2 + $0xa0] sm:$0xff]  ;;  %v2911_v53 = vmov 128.0  }
 0x13d   : > { %v642_v60 = vld [vmem:[#allocation2 + $0x98] sm:$0xff]  ;;  %v3120_v62 = vperm.slane %v3117_v59, 0  ;;  %v628_v7 = vld [vmem:[#allocation2 + $0xb0] sm:$0xff]  ;;  %v629_v11 = vld [vmem:[#allocation2] sm:$0xff]  ;;  %2554 = vrcp.f32 %v2911_v53 }
 0x13e   : > { %v640_v61 = vld [vmem:[#allocation2 + $0x18] sm:$0xff]  ;;  %v634_v13 = vld [vmem:[#allocation2 + $0x40] sm:$0xff]  ;;  %v649_v18 = vld [vmem:[#allocation2 + $0x50] sm:$0xff] }
 0x13f   : > { %v3123_v63 = vadd.f32 %v3120_v62, %v642_v60  ;;  %v3126_v0 = vadd.f32 %v3120_v62, %v640_v61  ;;  %v3133_v4 = vadd.f32 %v3120_v62, %v641_v1  ;;  %v3136_v5 = vadd.f32 %v3120_v62, %v643_v3  ;;  %v635_v12 = vld [vmem:[#allocation2 + $0x78] sm:$0xff]  ;;  %v644_v25 = vld [vmem:[#allocation2 + $0x20] sm:$0xff]  ;;  %v645_v28 = vld [vmem:[#allocation2 + $0x30] sm:$0xff] }
 0x140   : > { %v3145_v9 = vadd.f32 %v3120_v62, %v628_v7  ;;  %v3151_v14 = vadd.f32 %v3120_v62, %v629_v11  ;;  %v3154_v15 = vadd.f32 %v3120_v62, %v635_v12  ;;  %v3157_v16 = vadd.f32 %v3120_v62, %v634_v13  ;;  %v648_v17 = vld [vmem:[#allocation2 + $0x58] sm:$0xff]  ;;  %v630_v33 = vld [vmem:[#allocation2 + $0x10] sm:$0xff]  ;;  %v636_v34 = vld [vmem:[#allocation2 + $0x80] sm:$0xff] }
 0x141   : > { %707 = vadd.xlane.f32.xlu2 %v3123_v63  ;;  %703 = vadd.xlane.f32.xlu0 %v3126_v0  ;;  %v773_v2 = vmul.f32 %v3126_v0, %v3126_v0  ;;  %v774_v6 = vmul.f32 %v3133_v4, %v3133_v4  ;;  %v775_v8 = vmul.f32 %v3123_v63, %v3123_v63  ;;  %v631_v35 = vld [vmem:[#allocation2 + $0x48] sm:$0xff]  ;;  %v646_v50 = vld [vmem:[#allocation2 + $0x90] sm:$0xff]  ;;  %v2396_v61 = vld [vmem:[#allocation9 + $0x38] sm:$0xff] }
 0x142   : > { %v776_v10 = vmul.f32 %v3136_v5, %v3136_v5  ;;  %v3163_v19 = vadd.f32 %v3120_v62, %v648_v17  ;;  %v761_v20 = vmul.f32 %v3145_v9, %v3145_v9  ;;  %v3168_v21 = vadd.f32 %v3120_v62, %v649_v18  ;;  %v637_v39 = vld [vmem:[#allocation2 + $0x88] sm:$0xff]  ;;  %v647_v54 = vld [vmem:[#allocation2 + $0x38] sm:$0xff]  ;;  %v632_v1 = vld [vmem:[#allocation2 + $0x60] sm:$0xff]  ;;  %2422 = vmatpush.bf16.msra.mxu2 %v2396_v61 }
 0x143   : > { %810 = vadd.xlane.f32.xlu1 %v773_v2  ;;  %v762_v22 = vmul.f32 %v3151_v14, %v3151_v14  ;;  %v768_v23 = vmul.f32 %v3154_v15, %v3154_v15  ;;  %v767_v24 = vmul.f32 %v3157_v16, %v3157_v16  ;;  %v3181_v27 = vadd.f32 %v3120_v62, %v644_v25  ;;  %v651_v40 = vld [vmem:[#allocation2 + $0xa8] sm:$0xff]  ;;  %v2555_v56 = vpop.eup %2554  ;;  %v652_v11 = vld [vmem:[#allocation2 + $0xc0] sm:$0xff]  ;;  %v639_v17 = vld [vmem:[#allocation2 + $0x70] sm:$0xff] }
 0x144   : > { %v781_v26 = vmul.f32 %v3163_v19, %v3163_v19  ;;  %v782_v29 = vmul.f32 %v3168_v21, %v3168_v21  ;;  %v3187_v30 = vadd.f32 %v3120_v62, %v645_v28  ;;  %v3195_v36 = vadd.f32 %v3120_v62, %v630_v33  ;;  %v650_v41 = vld [vmem:[#allocation2 + $0x8] sm:$0xff]  ;;  %1417 = vmatpush.bf16.msra.mxu0 %v2396_v61 }
 0x145   : > { %v777_v32 = vmul.f32 %v3181_v27, %v3181_v27  ;;  %v3198_v37 = vadd.f32 %v3120_v62, %v636_v34  ;;  %v3201_v38 = vadd.f32 %v3120_v62, %v631_v35  ;;  %v3207_v42 = vadd.f32 %v3120_v62, %v637_v39  ;;  %v633_v58 = vld [vmem:[#allocation2 + $0x28] sm:$0xff]  ;;  %2421 = vmatpush.bf16.msra.mxu1 %v2396_v61 }
 0x146   : > { %v778_v31 = vmul.f32 %v3187_v30, %v3187_v30  ;;  %v3210_v43 = vadd.f32 %v3120_v62, %v651_v40  ;;  %v3213_v44 = vadd.f32 %v3120_v62, %v650_v41  ;;  %v763_v45 = vmul.f32 %v3195_v36, %v3195_v36  ;;  %2423 = vmatpush.bf16.msra.mxu3 %v2396_v61  ;;  %v2394_v13 = vld [vmem:[#allocation9 + $0x28] sm:$0xff]  ;;  %v2391_v40 = vld [vmem:[#allocation9 + $0x10] sm:$0xff] }
 0x147   : > { %v769_v46 = vmul.f32 %v3198_v37, %v3198_v37  ;;  %v764_v47 = vmul.f32 %v3201_v38, %v3201_v38  ;;  %v770_v48 = vmul.f32 %v3207_v42, %v3207_v42  ;;  %v3231_v52 = vadd.f32 %v3120_v62, %v646_v50 }
 0x148   : > { %v784_v49 = vmul.f32 %v3210_v43, %v3210_v43  ;;  %v783_v51 = vmul.f32 %v3213_v44, %v3213_v44  ;;  %v3236_v57 = vadd.f32 %v3120_v62, %v647_v54  ;;  %v730_v60 = vmul.f32 128.0, %v2555_v56 }
 0x149   : > { %709 = vadd.xlane.f32.xlu2 %v3136_v5  ;;  %705 = vadd.xlane.f32.xlu0 %v3133_v4  ;;  %v779_v55 = vmul.f32 %v3231_v52, %v3231_v52  ;;  %v3243_v3 = vadd.f32 %v3120_v62, %v633_v58  ;;  %v3246_v7 = vadd.f32 %v3120_v62, %v632_v1  ;;  %vm734_vm0 = vweird.f32 %v2555_v56  ;;  %v2389_v58 = vld [vmem:[#allocation9] sm:$0xff] }
 0x14a   : > { %v780_v2 = vmul.f32 %v3236_v57, %v3236_v57 }
 0x14b   : > { %812 = vadd.xlane.f32.xlu1 %v774_v6  ;;  %v731_v6 = vsub.f32 1.0, %v730_v60  ;;  %v766_v35 = vmul.f32 %v3243_v3, %v3243_v3 }
 0x14d   : > { %v732_v12 = vmul.f32 %v2555_v56, %v731_v6 }
 0x151   : > { %814 = vadd.xlane.f32.xlu0 %v775_v8  ;;  %679 = vadd.xlane.f32.xlu2 %v3145_v9  ;;  %v2395_v8 = vld [vmem:[#allocation9 + $0x30] sm:$0xff] }
 0x152   : > { %2425 = vmatpush.bf16.msra.mxu2 %v2395_v8  ;;  %1418 = vmatpush.bf16.msra.mxu0 %v2395_v8 }
 0x153   : > { %816 = vadd.xlane.f32.xlu1 %v776_v10  ;;  %v638_v10 = vld [vmem:[#allocation2 + $0xb8] sm:$0xff]  ;;  %2424 = vmatpush.bf16.msra.mxu1 %v2395_v8 }
 0x154   : > { %2426 = vmatpush.bf16.msra.mxu3 %v2395_v8  ;;  %v3251_v18 = vadd.f32 %v3120_v62, %v638_v10 }
 0x156   : > { %2428 = vmatpush.bf16.msra.mxu2 %v2394_v13  ;;  %1419 = vmatpush.bf16.msra.mxu0 %v2394_v13 }
 0x157   : > { %2427 = vmatpush.bf16.msra.mxu1 %v2394_v13 }
 0x158   : > { %2429 = vmatpush.bf16.msra.mxu3 %v2394_v13 }
 0x159   : > { %681 = vadd.xlane.f32.xlu0 %v3151_v14  ;;  %693 = vadd.xlane.f32.xlu2 %v3154_v15 }
 0x15b   : > { %691 = vadd.xlane.f32.xlu1 %v3157_v16 }
 0x161   : > { %719 = vadd.xlane.f32.xlu0 %v3163_v19  ;;  %786 = vadd.xlane.f32.xlu2 %v761_v20  ;;  %v3254_v20 = vadd.f32 %v3120_v62, %v652_v11 }
 0x163   : > { %721 = vadd.xlane.f32.xlu1 %v3168_v21 }
 0x169   : > { %788 = vadd.xlane.f32.xlu0 %v762_v22  ;;  %800 = vadd.xlane.f32.xlu2 %v768_v23  ;;  %v733_v22 = vadd.f32 %v2555_v56, %v732_v12  ;;  %v3257_v23 = vadd.f32 %v3120_v62, %v639_v17 }
 0x16b   : > { %798 = vadd.xlane.f32.xlu1 %v767_v24  ;;  %v2393_v24 = vld [vmem:[#allocation9 + $0x20] sm:$0xff]  ;;  %v3261_v25 = vsel %vm734_vm0, %v2555_v56, %v733_v22  ;;  %v772_v50 = vmul.f32 %v3257_v23, %v3257_v23 }
 0x16c   : > { %2431 = vmatpush.bf16.msra.mxu2 %v2393_v24  ;;  %1420 = vmatpush.bf16.msra.mxu0 %v2393_v24 }
 0x16d   : > { %2430 = vmatpush.bf16.msra.mxu1 %v2393_v24  ;;  %2432 = vmatpush.bf16.msra.mxu3 %v2393_v24 }
 0x171   : > { %826 = vadd.xlane.f32.xlu0 %v781_v26  ;;  %711 = vadd.xlane.f32.xlu2 %v3181_v27 }
 0x173   : > { %828 = vadd.xlane.f32.xlu1 %v782_v29  ;;  %v2392_v29 = vld [vmem:[#allocation9 + $0x18] sm:$0xff] }
 0x174   : > { %2434 = vmatpush.bf16.msra.mxu2 %v2392_v29  ;;  %1421 = vmatpush.bf16.msra.mxu0 %v2392_v29 }
 0x175   : > { %2433 = vmatpush.bf16.msra.mxu1 %v2392_v29  ;;  %2435 = vmatpush.bf16.msra.mxu3 %v2392_v29 }
 0x178   : > { %2437 = vmatpush.bf16.msra.mxu2 %v2391_v40  ;;  %1422 = vmatpush.bf16.msra.mxu0 %v2391_v40 }
 0x179   : > { %713 = vadd.xlane.f32.xlu0 %v3187_v30  ;;  %820 = vadd.xlane.f32.xlu2 %v778_v31  ;;  %v765_v31 = vmul.f32 %v3246_v7, %v3246_v7 }
 0x17a   : > { %2436 = vmatpush.bf16.msra.mxu1 %v2391_v40  ;;  %2438 = vmatpush.bf16.msra.mxu3 %v2391_v40 }
 0x17b   : > { %818 = vadd.xlane.f32.xlu1 %v777_v32  ;;  %v771_v32 = vmul.f32 %v3251_v18, %v3251_v18 }
 0x181   : > { %683 = vadd.xlane.f32.xlu0 %v3195_v36  ;;  %695 = vadd.xlane.f32.xlu2 %v3198_v37 }
 0x183   : > { %685 = vadd.xlane.f32.xlu1 %v3201_v38 }
 0x189   : > { %697 = vadd.xlane.f32.xlu0 %v3207_v42  ;;  %725 = vadd.xlane.f32.xlu2 %v3210_v43 }
 0x18b   : > { %723 = vadd.xlane.f32.xlu1 %v3213_v44 }
 0x191   : > { %790 = vadd.xlane.f32.xlu0 %v763_v45  ;;  %802 = vadd.xlane.f32.xlu2 %v769_v46 }
 0x193   : > { %792 = vadd.xlane.f32.xlu1 %v764_v47 }
 0x199   : > { %804 = vadd.xlane.f32.xlu0 %v770_v48  ;;  %832 = vadd.xlane.f32.xlu2 %v784_v49  ;;  %v2390_v48 = vld [vmem:[#allocation9 + $0x8] sm:$0xff] }
 0x19a   : > { %2440 = vmatpush.bf16.msra.mxu2 %v2390_v48  ;;  %1423 = vmatpush.bf16.msra.mxu0 %v2390_v48 }
 0x19b   : > { %830 = vadd.xlane.f32.xlu1 %v783_v51  ;;  %2439 = vmatpush.bf16.msra.mxu1 %v2390_v48 }
 0x19c   : > { %2441 = vmatpush.bf16.msra.mxu3 %v2390_v48 }
 0x19e   : > { %2443 = vmatpush.bf16.msra.mxu2 %v2389_v58  ;;  %1424 = vmatpush.bf16.msra.mxu0 %v2389_v58 }
 0x19f   : > { %2442 = vmatpush.bf16.msra.mxu1 %v2389_v58 }
 0x1a0   : > { %2444 = vmatpush.bf16.msra.mxu3 %v2389_v58 }
 0x1a1   : > { %715 = vadd.xlane.f32.xlu0 %v3231_v52  ;;  %822 = vadd.xlane.f32.xlu2 %v779_v55  ;;  %v785_v55 = vmul.f32 %v3254_v20, %v3254_v20 }
 0x1a3   : > { %717 = vadd.xlane.f32.xlu1 %v3236_v57 }
 0x1a9   : > { %824 = vadd.xlane.f32.xlu0 %v780_v2  ;;  %689 = vadd.xlane.f32.xlu2 %v3243_v3 }
 0x1ab   : > { %687 = vadd.xlane.f32.xlu1 %v3246_v7 }
 0x1b1   : > { %699 = vadd.xlane.f32.xlu0 %v3251_v18  ;;  %727 = vadd.xlane.f32.xlu2 %v3254_v20 }
 0x1b3   : > { %701 = vadd.xlane.f32.xlu1 %v3257_v23 }
 0x1b4   : > { %v708_v26 = vpop.xlane.xlu2 %707  ;;  %v704_v28 = vpop.xlane.xlu0 %703 }
 0x1b5   : > { %v3265_v62 = vmul.f32 %v3261_v25, %v704_v28  ;;  %v3287_v60 = vmul.f32 %v3261_v25, %v708_v26 }
 0x1b6   : > { %v811_v33 = vpop.xlane.xlu1 %810 }
 0x1b7   : > { %v873_v34 = vmul.f32 %v3265_v62, %v3265_v62  ;;  %v848_v39 = vmul.f32 %v811_v33, %v3261_v25  ;;  %v875_v10 = vmul.f32 %v3287_v60, %v3287_v60 }
 0x1b9   : > { %794 = vadd.xlane.f32.xlu0 %v765_v31  ;;  %806 = vadd.xlane.f32.xlu2 %v771_v32  ;;  %v898_v41 = vsub.f32 %v848_v39, %v873_v34 }
 0x1bb   : > { %796 = vadd.xlane.f32.xlu1 %v766_v35  ;;  %v923_v45 = vmax.f32 %v898_v41, 0.0 }
 0x1bc   : > { %v710_v46 = vpop.xlane.xlu2 %709  ;;  %v706_v47 = vpop.xlane.xlu0 %705 }
 0x1bd   : > { %v3277_v49 = vmul.f32 %v3261_v25, %v706_v47  ;;  %v973_v51 = vadd.f32 1e-05, %v923_v45  ;;  %v3290_v61 = vmul.f32 %v3261_v25, %v710_v46 }
 0x1be   : > { %v813_v53 = vpop.xlane.xlu1 %812 }
 0x1bf   : > { %v874_v54 = vmul.f32 %v3277_v49, %v3277_v49  ;;  %2556 = vrsqrt.f32 %v973_v51  ;;  %v849_v56 = vmul.f32 %v813_v53, %v3261_v25  ;;  %v876_v13 = vmul.f32 %v3290_v61, %v3290_v61 }
 0x1c0   : > { %vm1112_vm2 = vweird.f32 %v973_v51 }
 0x1c1   : > { %808 = vadd.xlane.f32.xlu0 %v772_v50  ;;  %v899_v1 = vsub.f32 %v849_v56, %v874_v54  ;;  %v3344_v54 = vperm.slane %v3117_v59, 2 }
 0x1c3   : > { %834 = vadd.xlane.f32.xlu1 %v785_v55  ;;  %v924_v2 = vmax.f32 %v899_v1, 0.0 }
 0x1c4   : > { %v815_v6 = vpop.xlane.xlu0 %814  ;;  %v680_v8 = vpop.xlane.xlu2 %679 }
 0x1c5   : > { %v850_v11 = vmul.f32 %v815_v6, %v3261_v25  ;;  %v2557_v12 = vpop.eup %2556  ;;  %v974_v17 = vadd.f32 1e-05, %v924_v2  ;;  %v3309_v55 = vmul.f32 %v3261_v25, %v680_v8  ;;  %v948_v2 = vsub.f32 %v3126_v0, %v3265_v62 }
 0x1c6   : > { %v817_v22 = vpop.xlane.xlu1 %816  ;;  %v1107_v24 = vmul.f32 %v2557_v12, %v973_v51  ;;  %vm1113_vm1 = vweird.f32 %v2557_v12  ;;  %v3326_v0 = vperm.slane %v3117_v59, 1 }
 0x1c7   : > { %v900_v26 = vsub.f32 %v850_v11, %v875_v10  ;;  %2558 = vrsqrt.f32 %v974_v17  ;;  %v851_v28 = vmul.f32 %v817_v22, %v3261_v25  ;;  %vm3304_vm3 = vmor %vm1112_vm2, %vm1113_vm1  ;;  %vm1122_vm5 = vweird.f32 %v974_v17 }
 0x1c8   : > { %v1108_v29 = vmul.f32 %v2557_v12, %v1107_v24  ;;  %v861_v24 = vmul.f32 %v3309_v55, %v3309_v55 }
 0x1c9   : > { %v925_v31 = vmax.f32 %v900_v26, 0.0  ;;  %v901_v32 = vsub.f32 %v851_v28, %v876_v13 }
 0x1ca   : > { %v1109_v33 = vmul.f32 0.5, %v1108_v29 }
 0x1cb   : > { %v3298_v34 = vadd.f32 1e-05, %v925_v31  ;;  %v926_v35 = vmax.f32 %v901_v32, 0.0 }
 0x1cc   : > { %v682_v39 = vpop.xlane.xlu0 %681  ;;  %v694_v40 = vpop.xlane.xlu2 %693  ;;  %v1110_v41 = vsub.f32 1.5, %v1109_v33 }
 0x1cd   : > { %2560 = vrsqrt.f32 %v3298_v34  ;;  %v2559_v45 = vpop.eup %2558  ;;  %v3301_v46 = vadd.f32 1e-05, %v926_v35  ;;  %v3331_v29 = vmul.f32 %v3261_v25, %v682_v39  ;;  %v3334_v32 = vmul.f32 %v3261_v25, %v694_v40 }
 0x1ce   : > { %v692_v47 = vpop.xlane.xlu1 %691  ;;  %v1111_v48 = vmul.f32 %v2557_v12, %v1110_v41  ;;  %v1117_v50 = vmul.f32 %v2559_v45, %v974_v17  ;;  %vm1123_vm4 = vweird.f32 %v2559_v45  ;;  %v949_v41 = vsub.f32 %v3133_v4, %v3277_v49 }
 0x1cf   : > { %2562 = vrsqrt.f32 %v3301_v46  ;;  %vm1124_vm6 = vmor %vm1122_vm5, %vm1123_vm4  ;;  %v3337_v33 = vmul.f32 %v3261_v25, %v692_v47  ;;  %vm1142_vm7 = vweird.f32 %v3301_v46  ;;  %v862_v40 = vmul.f32 %v3331_v29, %v3331_v29 }
 0x1d0   : > { %v1118_v53 = vmul.f32 %v2559_v45, %v1117_v50  ;;  %v1115_v1 = vsel %vm3304_vm3, %v2557_v12, %v1111_v48  ;;  %v868_v4 = vmul.f32 %v3334_v32, %v3334_v32  ;;  %vm1132_vm10 = vweird.f32 %v3298_v34 }
 0x1d1   : > { %v1248_v26 = vmul.f32 %v1115_v1, %v948_v2  ;;  %v867_v49 = vmul.f32 %v3337_v33, %v3337_v33 }
 0x1d2   : > { %v1119_v58 = vmul.f32 0.5, %v1118_v53 }
 0x1d3   : > { %v3311_v56 = vpop.eup %2560  ;;  %v1274_v39 = vmul.f32 %v3326_v0, %v1248_v26 }
 0x1d4   : > { %v1127_v51 = vmul.f32 %v3311_v56, %v3298_v34  ;;  %v720_v6 = vpop.xlane.xlu0 %719  ;;  %v787_v10 = vpop.xlane.xlu2 %786  ;;  %v1120_v11 = vsub.f32 1.5, %v1119_v58  ;;  %vm1133_vm9 = vweird.f32 %v3311_v56 }
 0x1d5   : > { %v836_v13 = vmul.f32 %v787_v10, %v3261_v25  ;;  %v3320_v8 = vpop.eup %2562  ;;  %vm3379_vm12 = vmor %vm1132_vm10, %vm1133_vm9 }
 0x1d6   : > { %v1128_v22 = vmul.f32 %v3311_v56, %v1127_v51  ;;  %v722_v12 = vpop.xlane.xlu1 %721  ;;  %v1121_v62 = vmul.f32 %v2559_v45, %v1120_v11  ;;  %v1137_v28 = vmul.f32 %v3320_v8, %v3301_v46  ;;  %vm1143_vm8 = vweird.f32 %v3320_v8 }
 0x1d7   : > { %v886_v35 = vsub.f32 %v836_v13, %v861_v24  ;;  %v1300_v24 = vadd.f32 %v3344_v54, %v1274_v39  ;;  %vm3374_vm11 = vmor %vm1142_vm7, %vm1143_vm8 }
 0x1d8   : > { %v1129_v31 = vmul.f32 0.5, %v1128_v22  ;;  %v1138_v17 = vmul.f32 %v3320_v8, %v1137_v28  ;;  %v1125_v48 = vsel %vm1124_vm6, %v2559_v45, %v1121_v62 }
 0x1d9   : > { %v911_v53 = vmax.f32 %v886_v35, 0.0  ;;  %v1249_v47 = vmul.f32 %v1125_v48, %v949_v41  ;;  %v950_v35 = vsub.f32 %v3123_v63, %v3287_v60  ;;  %v951_v41 = vsub.f32 %v3136_v5, %v3290_v61 }
 0x1da   : > { %v1130_v50 = vsub.f32 1.5, %v1129_v31  ;;  %v1139_v58 = vmul.f32 0.5, %v1138_v17  ;;  %v3387_v61 = vmul.f32 %v3261_v25, %v720_v6  ;;  %v1325_v34 = vmax.f32 %v1300_v24, 0.0 }
 0x1db   : > { %v3354_v45 = vadd.f32 1e-05, %v911_v53  ;;  %v1275_v11 = vmul.f32 %v3326_v0, %v1249_v47 }
 0x1dc   : > { %v789_v1 = vpop.xlane.xlu0 %788  ;;  %v801_v59 = vpop.xlane.xlu2 %800  ;;  %v1140_v2 = vsub.f32 1.5, %v1139_v58  ;;  %v1131_v13 = vmul.f32 %v3311_v56, %v1130_v50  ;;  %v3393_v58 = vmul.f32 %v3261_v25, %v722_v12  ;;  %v881_v12 = vmul.f32 %v3387_v61, %v3387_v61 }
 0x1dd   : > { %v837_v51 = vmul.f32 %v789_v1, %v3261_v25  ;;  %v843_v10 = vmul.f32 %v801_v59, %v3261_v25  ;;  %2564 = vrsqrt.f32 %v3354_v45  ;;  %v1301_v48 = vadd.f32 %v3344_v54, %v1275_v11 }
 0x1de   : > { %v799_v22 = vpop.xlane.xlu1 %798  ;;  %v1141_v26 = vmul.f32 %v3320_v8, %v1140_v2  ;;  %v1135_v39 = vsel %vm3379_vm12, %v3311_v56, %v1131_v13  ;;  %vm992_vm14 = vweird.f32 %v3354_v45 }
 0x1df   : > { %v887_v62 = vsub.f32 %v837_v51, %v862_v40  ;;  %v893_v28 = vsub.f32 %v843_v10, %v868_v4  ;;  %v842_v31 = vmul.f32 %v799_v22, %v3261_v25  ;;  %v1326_v46 = vmax.f32 %v1301_v48, 0.0 }
 0x1e0   : > { %v1145_v5 = vsel %vm3374_vm11, %v3320_v8, %v1141_v26  ;;  %v1250_v56 = vmul.f32 %v1135_v39, %v950_v35  ;;  %v882_v22 = vmul.f32 %v3393_v58, %v3393_v58  ;;  %v936_v48 = vsub.f32 %v3145_v9, %v3309_v55 }
 0x1e1   : > { %v912_v63 = vmax.f32 %v887_v62, 0.0  ;;  %v918_v60 = vmax.f32 %v893_v28, 0.0  ;;  %v892_v53 = vsub.f32 %v842_v31, %v867_v49  ;;  %v1345_v8 = vpack.c.bf16 %v1326_v46, %v1325_v34 }
 0x1e2   : > { %v1251_v59 = vmul.f32 %v1145_v5, %v951_v41  ;;  %v1276_v35 = vmul.f32 %v3326_v0, %v1250_v56 }
 0x1e3   : > { %v3395_v40 = vadd.f32 1e-05, %v912_v63  ;;  %v3397_v47 = vadd.f32 1e-05, %v918_v60  ;;  %v917_v4 = vmax.f32 %v892_v53, 0.0  ;;  %v3399_v49 = vpop.eup %2564  ;;  %1455 = vmatmul.bf16.vlgmr.msra.gmra.mxu2 %v1345_v8 }
 0x1e4   : > { %v827_v1 = vpop.xlane.xlu0 %826  ;;  %v712_v6 = vpop.xlane.xlu2 %711  ;;  %v987_v2 = vmul.f32 %v3399_v49, %v3354_v45  ;;  %v1277_v62 = vmul.f32 %v3326_v0, %v1251_v59  ;;  %v1302_v59 = vadd.f32 %v3344_v54, %v1276_v35  ;;  %vm993_vm13 = vweird.f32 %v3399_v49 }
 0x1e5   : > { %2566 = vrsqrt.f32 %v3395_v40  ;;  %v3407_v51 = vadd.f32 1e-05, %v917_v4  ;;  %v856_v10 = vmul.f32 %v827_v1, %v3261_v25  ;;  %v3422_v50 = vmul.f32 %v3261_v25, %v712_v6  ;;  %vm3469_vm15 = vmor %vm992_vm14, %vm993_vm13 }
 0x1e6   : > { %2568 = vrsqrt.f32 %v3397_v47  ;;  %v829_v11 = vpop.xlane.xlu1 %828  ;;  %v988_v13 = vmul.f32 %v3399_v49, %v987_v2  ;;  %v1303_v4 = vadd.f32 %v3344_v54, %v1277_v62  ;;  %vm1002_vm0 = vweird.f32 %v3395_v40 }
 0x1e7   : > { %v857_v24 = vmul.f32 %v829_v11, %v3261_v25  ;;  %2570 = vrsqrt.f32 %v3407_v51  ;;  %v906_v26 = vsub.f32 %v856_v10, %v881_v12  ;;  %vm1062_vm1 = vweird.f32 %v3397_v47 }
 0x1e8   : > { %v989_v28 = vmul.f32 0.5, %v988_v13  ;;  %vm1052_vm3 = vweird.f32 %v3407_v51 }
 0x1e9   : > { %v907_v31 = vsub.f32 %v857_v24, %v882_v22  ;;  %v931_v41 = vmax.f32 %v906_v26, 0.0  ;;  %v877_v22 = vmul.f32 %v3422_v50, %v3422_v50 }
 0x1ea   : > { %v990_v53 = vsub.f32 1.5, %v989_v28  ;;  %v1328_v28 = vmax.f32 %v1303_v4, 0.0 }
 0x1eb   : > { %v3417_v17 = vpop.eup %2566  ;;  %v932_v63 = vmax.f32 %v907_v31, 0.0  ;;  %v3428_v34 = vadd.f32 1e-05, %v931_v41 }
 0x1ec   : > { %v3424_v60 = vpop.eup %2568  ;;  %v997_v5 = vmul.f32 %v3417_v17, %v3395_v40  ;;  %v714_v46 = vpop.xlane.xlu0 %713  ;;  %v991_v24 = vmul.f32 %v3399_v49, %v990_v53  ;;  %v1327_v53 = vmax.f32 %v1302_v59, 0.0  ;;  %vm1003_vm2 = vweird.f32 %v3417_v17 }
 0x1ed   : > { %v821_v39 = vpop.xlane.xlu2 %820  ;;  %v1057_v1 = vmul.f32 %v3424_v60, %v3397_v47  ;;  %v3435_v6 = vadd.f32 1e-05, %v932_v63  ;;  %v3438_v2 = vpop.eup %2570  ;;  %2572 = vrsqrt.f32 %v3428_v34  ;;  %v3444_v12 = vmul.f32 %v3261_v25, %v714_v46  ;;  %vm3509_vm6 = vmor %vm1002_vm0, %vm1003_vm2 }
 0x1ee   : > { %v998_v56 = vmul.f32 %v3417_v17, %v997_v5  ;;  %v819_v10 = vpop.xlane.xlu1 %818  ;;  %v1047_v13 = vmul.f32 %v3438_v2, %v3407_v51  ;;  %v853_v41 = vmul.f32 %v821_v39, %v3261_v25  ;;  %v1346_v45 = vpack.c.bf16 %v1328_v28, %v1327_v53 }
 0x1ef   : > { %v1058_v11 = vmul.f32 %v3424_v60, %v1057_v1  ;;  %2574 = vrsqrt.f32 %v3435_v6  ;;  %v878_v62 = vmul.f32 %v3444_v12, %v3444_v12  ;;  %v852_v63 = vmul.f32 %v819_v10, %v3261_v25 }
 0x1f0   : > { %v999_v26 = vmul.f32 0.5, %v998_v56  ;;  %v1048_v35 = vmul.f32 %v3438_v2, %v1047_v13  ;;  %vm1063_vm4 = vweird.f32 %v3424_v60  ;;  %vm1053_vm5 = vweird.f32 %v3438_v2 }
 0x1f1   : > { %v1059_v31 = vmul.f32 0.5, %v1058_v11  ;;  %v903_v8 = vsub.f32 %v853_v41, %v878_v62  ;;  %v902_v4 = vsub.f32 %v852_v63, %v877_v22  ;;  %v995_v41 = vsel %vm3469_vm15, %v3399_v49, %v991_v24  ;;  %vm3522_vm7 = vmor %vm1062_vm1, %vm1063_vm4 }
 0x1f2   : > { %v1000_v1 = vsub.f32 1.5, %v999_v26  ;;  %v1049_v56 = vmul.f32 0.5, %v1048_v35  ;;  %vm3537_vm8 = vmor %vm1052_vm3, %vm1053_vm5  ;;  %vm1192_vm9 = vweird.f32 %v3428_v34  ;;  %vm1202_vm11 = vweird.f32 %v3435_v6 }
 0x1f3   : > { %v3463_v11 = vpop.eup %2572  ;;  %v1060_v62 = vsub.f32 1.5, %v1059_v31  ;;  %v928_v39 = vmax.f32 %v903_v8, 0.0  ;;  %v927_v28 = vmax.f32 %v902_v4, 0.0  ;;  %1460 = vmatmul.bf16.gmra.mxu2 %v1346_v45  ;;  %v1236_v8 = vmul.f32 %v995_v41, %v936_v48 }
 0x1f4   : > { %v684_v59 = vpop.xlane.xlu0 %683  ;;  %v1187_v35 = vmul.f32 %v3463_v11, %v3428_v34  ;;  %v1050_v63 = vsub.f32 1.5, %v1049_v56  ;;  %v1001_v5 = vmul.f32 %v3417_v17, %v1000_v1  ;;  %v952_v1 = vsub.f32 %v3181_v27, %v3422_v50 }
 0x1f5   : > { %v696_v26 = vpop.xlane.xlu2 %695  ;;  %v3476_v22 = vpop.eup %2574  ;;  %v3491_v10 = vadd.f32 1e-05, %v928_v39  ;;  %v3493_v49 = vadd.f32 1e-05, %v927_v28  ;;  %v1061_v56 = vmul.f32 %v3424_v60, %v1060_v62  ;;  %v3515_v48 = vmul.f32 %v3261_v25, %v684_v59 }
 0x1f6   : > { %v1197_v13 = vmul.f32 %v3476_v22, %v3435_v6  ;;  %v686_v53 = vpop.xlane.xlu1 %685  ;;  %v1188_v31 = vmul.f32 %v3463_v11, %v1187_v35  ;;  %v1051_v4 = vmul.f32 %v3438_v2, %v1050_v63  ;;  %v1005_v59 = vsel %vm3509_vm6, %v3417_v17, %v1001_v5 }
 0x1f7   : > { %2576 = vrsqrt.f32 %v3491_v10  ;;  %v3527_v45 = vmul.f32 %v3261_v25, %v686_v53  ;;  %v1262_v41 = vmul.f32 %v3326_v0, %v1236_v8  ;;  %vm1193_vm10 = vweird.f32 %v3463_v11 }
 0x1f8   : > { %v1198_v46 = vmul.f32 %v3476_v22, %v1197_v13  ;;  %v1189_v24 = vmul.f32 0.5, %v1188_v31  ;;  %2578 = vrsqrt.f32 %v3493_v49  ;;  %v3518_v13 = vmul.f32 %v3261_v25, %v696_v26  ;;  %vm3567_vm13 = vmor %vm1192_vm9, %vm1193_vm10 }
 0x1f9   : > { %v4600_v63 = vsub.f32 %v3151_v14, %v3331_v29  ;;  %v1288_v51 = vadd.f32 %v3344_v54, %v1262_v41  ;;  %v1055_v53 = vsel %vm3537_vm8, %v3438_v2, %v1051_v4  ;;  %v1065_v34 = vsel %vm3522_vm7, %v3424_v60, %v1061_v56 }
 0x1fa   : > { %v1199_v39 = vmul.f32 0.5, %v1198_v46  ;;  %v1190_v55 = vsub.f32 1.5, %v1189_v24  ;;  %vm1203_vm12 = vweird.f32 %v3476_v22  ;;  %v863_v14 = vmul.f32 %v3515_v48, %v3515_v48 }
 0x1fb   : > { %v1237_v17 = vmul.f32 %v1005_v59, %v4600_v63  ;;  %v869_v29 = vmul.f32 %v3518_v13, %v3518_v13  ;;  %v864_v60 = vmul.f32 %v3527_v45, %v3527_v45  ;;  %v4603_v56 = vsub.f32 %v3157_v16, %v3337_v33  ;;  %vm3603_vm0 = vmor %vm1202_vm11, %vm1203_vm12 }
 0x1fc   : > { %v1200_v40 = vsub.f32 1.5, %v1199_v39  ;;  %v698_v62 = vpop.xlane.xlu0 %697  ;;  %v1191_v26 = vmul.f32 %v3463_v11, %v1190_v55  ;;  %v4604_v46 = vsub.f32 %v3154_v15, %v3334_v32  ;;  %vm1152_vm15 = vweird.f32 %v3493_v49 }
 0x1fd   : > { %v726_v35 = vpop.xlane.xlu2 %725  ;;  %v3548_v5 = vmul.f32 %v3261_v25, %v698_v62  ;;  %v3565_v31 = vpop.eup %2576  ;;  %v1263_v24 = vmul.f32 %v3326_v0, %v1237_v17  ;;  %v1242_v4 = vmul.f32 %v1055_v53, %v4603_v56  ;;  %vm1162_vm1 = vweird.f32 %v3491_v10 }
 0x1fe   : > { %v3550_v28 = vpop.xlane.xlu1 %723  ;;  %v1201_v2 = vmul.f32 %v3476_v22, %v1200_v40  ;;  %v3578_v39 = vpop.eup %2578  ;;  %v1157_v9 = vmul.f32 %v3565_v31, %v3491_v10  ;;  %v3583_v55 = vmul.f32 %v3261_v25, %v726_v35  ;;  %v1243_v40 = vmul.f32 %v1065_v34, %v4604_v46 }
 0x1ff   : > { %v1195_v62 = vsel %vm3567_vm13, %v3463_v11, %v1191_v26  ;;  %vm1163_vm14 = vweird.f32 %v3565_v31  ;;  %v1147_v16 = vmul.f32 %v3578_v39, %v3493_v49  ;;  %v3597_v33 = vmul.f32 %v3548_v5, %v3548_v5 }
 0x200   : > { %v1313_v35 = vmax.f32 %v1288_v51, 0.0  ;;  %v1158_v32 = vmul.f32 %v3565_v31, %v1157_v9  ;;  %v1289_v11 = vadd.f32 %v3344_v54, %v1263_v24  ;;  %v1268_v59 = vmul.f32 %v3326_v0, %v1242_v4  ;;  %vm3659_vm4 = vmor %vm1162_vm1, %vm1163_vm14 }
 0x201   : > { %v1269_v41 = vmul.f32 %v3326_v0, %v1243_v40  ;;  %v1148_v47 = vmul.f32 %v3578_v39, %v1147_v16  ;;  %vm1153_vm2 = vweird.f32 %v3578_v39  ;;  %v1205_v63 = vsel %vm3603_vm0, %v3476_v22, %v1201_v2 }
 0x202   : > { %v4607_v17 = vsub.f32 %v3163_v19, %v3387_v61  ;;  %v1159_v53 = vmul.f32 0.5, %v1158_v32  ;;  %v1314_v34 = vmax.f32 %v1289_v11, 0.0  ;;  %v1294_v8 = vadd.f32 %v3344_v54, %v1268_v59  ;;  %vm3636_vm3 = vmor %vm1152_vm15, %vm1153_vm2 }
 0x203   : > { %v1295_v24 = vadd.f32 %v3344_v54, %v1269_v41  ;;  %v1149_v56 = vmul.f32 0.5, %v1148_v47  ;;  %v4608_v40 = vsub.f32 %v3168_v21, %v3393_v58 }
 0x204   : > { %v791_v26 = vpop.xlane.xlu0 %790  ;;  %v1256_v51 = vmul.f32 %v1195_v62, %v4607_v17  ;;  %v1160_v2 = vsub.f32 1.5, %v1159_v53  ;;  %v1339_v16 = vpack.c.bf16 %v1314_v34, %v1313_v35  ;;  %v1319_v19 = vmax.f32 %v1294_v8, 0.0 }
 0x205   : > { %v803_v6 = vpop.xlane.xlu2 %802  ;;  %v838_v4 = vmul.f32 %v791_v26, %v3261_v25  ;;  %v1257_v22 = vmul.f32 %v1205_v63, %v4608_v40  ;;  %v1320_v61 = vmax.f32 %v1295_v24, 0.0  ;;  %v1150_v62 = vsub.f32 1.5, %v1149_v56 }
 0x206   : > { %v844_v9 = vmul.f32 %v803_v6, %v3261_v25  ;;  %v793_v46 = vpop.xlane.xlu1 %792  ;;  %v1161_v59 = vmul.f32 %v3565_v31, %v1160_v2  ;;  %1425 = vmatmul.bf16.vlgmr.msra.gmra.mxu0 %v1339_v16  ;;  %v1282_v47 = vmul.f32 %v3326_v0, %v1256_v51  ;;  %v3644_v63 = vmul.f32 %v3261_v25, %v3550_v28 }
 0x207   : > { %v888_v15 = vsub.f32 %v838_v4, %v863_v14  ;;  %v839_v11 = vmul.f32 %v793_v46, %v3261_v25  ;;  %v1342_v41 = vpack.c.bf16 %v1320_v61, %v1319_v19  ;;  %v1283_v26 = vmul.f32 %v3326_v0, %v1257_v22 }
 0x208   : > { %v894_v32 = vsub.f32 %v844_v9, %v869_v29  ;;  %v1151_v21 = vmul.f32 %v3578_v39, %v1150_v62  ;;  %v884_v29 = vmul.f32 %v3583_v55, %v3583_v55  ;;  %v1308_v17 = vadd.f32 %v3344_v54, %v1282_v47 }
 0x209   : > { %v913_v58 = vmax.f32 %v888_v15, 0.0  ;;  %v889_v35 = vsub.f32 %v839_v11, %v864_v60  ;;  %1440 = vmatmul.bf16.vlgmr.msra.gmra.mxu1 %v1342_v41  ;;  %v1309_v60 = vadd.f32 %v3344_v54, %v1283_v26  ;;  %v953_v40 = vsub.f32 %v3187_v30, %v3444_v12 }
 0x20a   : > { %v919_v6 = vmax.f32 %v894_v32, 0.0  ;;  %v1155_v24 = vsel %vm3636_vm3, %v3578_v39, %v1151_v21  ;;  %v1333_v56 = vmax.f32 %v1308_v17, 0.0  ;;  %v1165_v10 = vsel %vm3659_vm4, %v3565_v31, %v1161_v59 }
 0x20b   : > { %v3648_v51 = vadd.f32 1e-05, %v913_v58  ;;  %v914_v49 = vmax.f32 %v889_v35, 0.0  ;;  %v1334_v4 = vmax.f32 %v1309_v60, 0.0  ;;  %v883_v61 = vmul.f32 %v3644_v63, %v3644_v63 }
 0x20c   : > { %v3650_v53 = vadd.f32 1e-05, %v919_v6  ;;  %v805_v34 = vpop.xlane.xlu0 %804  ;;  %v1252_v12 = vmul.f32 %v1155_v24, %v952_v1  ;;  %v1253_v15 = vmul.f32 %v1165_v10, %v953_v40  ;;  %v945_v40 = vsub.f32 %v3207_v42, %v3548_v5 }
 0x20d   : > { %v833_v8 = vpop.xlane.xlu2 %832  ;;  %v845_v9 = vmul.f32 %v805_v34, %v3261_v25  ;;  %2580 = vrsqrt.f32 %v3648_v51  ;;  %v3668_v39 = vadd.f32 1e-05, %v914_v49  ;;  %v1349_v2 = vpack.c.bf16 %v1334_v4, %v1333_v56 }
 0x20e   : > { %v859_v46 = vmul.f32 %v833_v8, %v3261_v25  ;;  %v831_v22 = vpop.xlane.xlu1 %830  ;;  %2582 = vrsqrt.f32 %v3650_v53  ;;  %v1278_v11 = vmul.f32 %v3326_v0, %v1252_v12  ;;  %v1279_v26 = vmul.f32 %v3326_v0, %v1253_v15 }
 0x20f   : > { %v895_v16 = vsub.f32 %v845_v9, %v3597_v33  ;;  %2584 = vrsqrt.f32 %v3668_v39  ;;  %v858_v30 = vmul.f32 %v831_v22, %v3261_v25  ;;  %1475 = vmatmul.bf16.vlgmr.msra.gmra.mxu3 %v1349_v2  ;;  %v944_v34 = vsub.f32 %v3198_v37, %v3518_v13 }
 0x210   : > { %v909_v19 = vsub.f32 %v859_v46, %v884_v29  ;;  %v1304_v21 = vadd.f32 %v3344_v54, %v1278_v11  ;;  %v938_v29 = vsub.f32 %v3195_v36, %v3515_v48  ;;  %v1305_v8 = vadd.f32 %v3344_v54, %v1279_v26 }
 0x211   : > { %v920_v62 = vmax.f32 %v895_v16, 0.0  ;;  %v908_v32 = vsub.f32 %v858_v30, %v883_v61  ;;  %v939_v46 = vsub.f32 %v3201_v38, %v3527_v45  ;;  %v959_v16 = vsub.f32 %v3210_v43, %v3583_v55 }
 0x212   : > { %v934_v31 = vmax.f32 %v909_v19, 0.0  ;;  %v1329_v24 = vmax.f32 %v1304_v21, 0.0  ;;  %v1330_v22 = vmax.f32 %v1305_v8, 0.0  ;;  %vm1012_vm5 = vweird.f32 %v3648_v51 }
 0x213   : > { %v3683_v33 = vadd.f32 1e-05, %v920_v62  ;;  %v3687_v41 = vpop.eup %2580  ;;  %v933_v47 = vmax.f32 %v908_v32, 0.0  ;;  %v958_v62 = vsub.f32 %v3213_v44, %v3644_v63  ;;  %vm1022_vm6 = vweird.f32 %v3668_v39 }
 0x214   : > { %v3685_v59 = vadd.f32 1e-05, %v934_v31  ;;  %v716_v27 = vpop.xlane.xlu0 %715  ;;  %v3691_v1 = vpop.eup %2582  ;;  %v1007_v58 = vmul.f32 %v3687_v41, %v3648_v51  ;;  %v1347_v32 = vpack.c.bf16 %v1330_v22, %v1329_v24  ;;  %vm1013_vm7 = vweird.f32 %v3687_v41 }
 0x215   : > { %v823_v50 = vpop.xlane.xlu2 %822  ;;  %2586 = vrsqrt.f32 %v3683_v33  ;;  %v3696_v6 = vpop.eup %2584  ;;  %v1067_v35 = vmul.f32 %v3691_v1, %v3650_v53  ;;  %v3706_v49 = vadd.f32 1e-05, %v933_v47  ;;  %v3712_v28 = vmul.f32 %v3261_v25, %v716_v27  ;;  %vm3765_vm13 = vmor %vm1012_vm5, %vm1013_vm7 }
 0x216   : > { %2588 = vrsqrt.f32 %v3685_v59  ;;  %v718_v14 = vpop.xlane.xlu1 %717  ;;  %v1008_v17 = vmul.f32 %v3687_v41, %v1007_v58  ;;  %v1017_v60 = vmul.f32 %v3696_v6, %v3668_v39  ;;  %v854_v61 = vmul.f32 %v823_v50, %v3261_v25  ;;  %1465 = vmatmul.bf16.gmra.mxu2 %v1347_v32 }
 0x217   : > { %v1068_v4 = vmul.f32 %v3691_v1, %v1067_v35  ;;  %2590 = vrsqrt.f32 %v3706_v49  ;;  %v879_v10 = vmul.f32 %v3712_v28, %v3712_v28  ;;  %v3729_v30 = vmul.f32 %v3261_v25, %v718_v14 }
 0x218   : > { %v1009_v56 = vmul.f32 0.5, %v1008_v17  ;;  %v1018_v9 = vmul.f32 %v3696_v6, %v1017_v60  ;;  %vm1072_vm8 = vweird.f32 %v3650_v53  ;;  %vm1073_vm9 = vweird.f32 %v3691_v1 }
 0x219   : > { %v1069_v26 = vmul.f32 0.5, %v1068_v4  ;;  %v904_v58 = vsub.f32 %v854_v61, %v879_v10  ;;  %vm1082_vm10 = vweird.f32 %v3683_v33  ;;  %v880_v60 = vmul.f32 %v3729_v30, %v3729_v30  ;;  %vm3804_vm2 = vmor %vm1072_vm8, %vm1073_vm9 }
 0x21a   : > { %v1019_v19 = vmul.f32 0.5, %v1018_v9  ;;  %v1010_v31 = vsub.f32 1.5, %v1009_v56  ;;  %vm1023_vm11 = vweird.f32 %v3696_v6  ;;  %vm1222_vm12 = vweird.f32 %v3685_v59 }
 0x21b   : > { %v3723_v2 = vpop.eup %2586  ;;  %v929_v9 = vmax.f32 %v904_v58, 0.0  ;;  %v1070_v22 = vsub.f32 1.5, %v1069_v26  ;;  %vm1212_vm14 = vweird.f32 %v3706_v49  ;;  %vm3785_vm15 = vmor %vm1022_vm6, %vm1023_vm11 }
 0x21c   : > { %v3731_v12 = vpop.eup %2588  ;;  %v1077_v15 = vmul.f32 %v3723_v2, %v3683_v33  ;;  %v825_v11 = vpop.xlane.xlu0 %824  ;;  %v1020_v27 = vsub.f32 1.5, %v1019_v19  ;;  %v1011_v24 = vmul.f32 %v3687_v41, %v1010_v31  ;;  %vm1083_vm0 = vweird.f32 %v3723_v2 }
 0x21d   : > { %v690_v47 = vpop.xlane.xlu2 %689  ;;  %v1217_v21 = vmul.f32 %v3731_v12, %v3685_v59  ;;  %v3744_v14 = vpop.eup %2590  ;;  %v855_v8 = vmul.f32 %v825_v11, %v3261_v25  ;;  %v3759_v11 = vadd.f32 1e-05, %v929_v9  ;;  %vm1223_vm3 = vweird.f32 %v3731_v12  ;;  %vm3817_vm4 = vmor %vm1082_vm10, %vm1083_vm0 }
 0x21e   : > { %v1078_v50 = vmul.f32 %v3723_v2, %v1077_v15  ;;  %v688_v35 = vpop.xlane.xlu1 %687  ;;  %v1207_v4 = vmul.f32 %v3744_v14, %v3706_v49  ;;  %v1021_v61 = vmul.f32 %v3696_v6, %v1020_v27  ;;  %v1015_v51 = vsel %vm3765_vm13, %v3687_v41, %v1011_v24  ;;  %vm3862_vm6 = vmor %vm1222_vm12, %vm1223_vm3 }
 0x21f   : > { %v1218_v17 = vmul.f32 %v3731_v12, %v1217_v21  ;;  %v905_v19 = vsub.f32 %v855_v8, %v880_v60  ;;  %v3771_v21 = vmul.f32 %v3261_v25, %v690_v47  ;;  %v3774_v27 = vmul.f32 %v3261_v25, %v688_v35 }
 0x220   : > { %v1079_v56 = vmul.f32 0.5, %v1078_v50  ;;  %v1208_v32 = vmul.f32 %v3744_v14, %v1207_v4  ;;  %2592 = vrsqrt.f32 %v3759_v11  ;;  %v1071_v8 = vmul.f32 %v3691_v1, %v1070_v22 }
 0x221   : > { %v1219_v10 = vmul.f32 0.5, %v1218_v17  ;;  %v930_v26 = vmax.f32 %v905_v19, 0.0  ;;  %vm1213_vm1 = vweird.f32 %v3744_v14  ;;  %v1025_v39 = vsel %vm3785_vm15, %v3696_v6, %v1021_v61 }
 0x222   : > { %v1080_v15 = vsub.f32 1.5, %v1079_v56  ;;  %v1209_v58 = vmul.f32 0.5, %v1208_v32  ;;  %v954_v22 = vsub.f32 %v3231_v52, %v3712_v28  ;;  %v866_v61 = vmul.f32 %v3771_v21, %v3771_v21  ;;  %vm3831_vm5 = vmor %vm1212_vm14, %vm1213_vm1 }
 0x223   : > { %v1220_v50 = vsub.f32 1.5, %v1219_v10  ;;  %v3791_v35 = vadd.f32 1e-05, %v930_v26  ;;  %v1238_v10 = vmul.f32 %v1015_v51, %v938_v29  ;;  %v1239_v32 = vmul.f32 %v1025_v39, %v939_v46 }
 0x224   : > { %v700_v17 = vpop.xlane.xlu0 %699  ;;  %v1081_v56 = vmul.f32 %v3723_v2, %v1080_v15  ;;  %v1210_v4 = vsub.f32 1.5, %v1209_v58  ;;  %v865_v15 = vmul.f32 %v3774_v27, %v3774_v27  ;;  %v1075_v26 = vsel %vm3804_vm2, %v3691_v1, %v1071_v8 }
 0x225   : > { %v728_v60 = vpop.xlane.xlu2 %727  ;;  %v3795_v41 = vmul.f32 %v3261_v25, %v700_v17  ;;  %2594 = vrsqrt.f32 %v3791_v35  ;;  %v1221_v53 = vmul.f32 %v3731_v12, %v1220_v50  ;;  %v1264_v49 = vmul.f32 %v3326_v0, %v1238_v10 }
 0x226   : > { %v702_v24 = vpop.xlane.xlu1 %701  ;;  %v1211_v19 = vmul.f32 %v3744_v14, %v1210_v4  ;;  %v3838_v33 = vmul.f32 %v3261_v25, %v728_v60  ;;  %v3846_v31 = vpop.eup %2592  ;;  %v1085_v50 = vsel %vm3817_vm4, %v3723_v2, %v1081_v56  ;;  %v1265_v1 = vmul.f32 %v3326_v0, %v1239_v32 }
 0x227   : > { %v871_v48 = vmul.f32 %v3795_v41, %v3795_v41  ;;  %v3841_v29 = vmul.f32 %v3261_v25, %v702_v24  ;;  %v1167_v45 = vmul.f32 %v3846_v31, %v3759_v11  ;;  %vm1173_vm7 = vweird.f32 %v3846_v31 }
 0x228   : > { %v1215_v58 = vsel %vm3831_vm5, %v3744_v14, %v1211_v19  ;;  %v1244_v46 = vmul.f32 %v1075_v26, %v944_v34  ;;  %v1290_v2 = vadd.f32 %v3344_v54, %v1264_v49  ;;  %v1245_v59 = vmul.f32 %v1085_v50, %v945_v40 }
 0x229   : > { %v1225_v60 = vsel %vm3862_vm6, %v3731_v12, %v1221_v53  ;;  %v1258_v51 = vmul.f32 %v1215_v58, %v958_v62  ;;  %v1168_v37 = vmul.f32 %v3846_v31, %v1167_v45  ;;  %vm1172_vm8 = vweird.f32 %v3759_v11 }
 0x22a   : > { %v1291_v13 = vadd.f32 %v3344_v54, %v1265_v1  ;;  %vm1182_vm9 = vweird.f32 %v3791_v35  ;;  %v1315_v44 = vmax.f32 %v1290_v2, 0.0  ;;  %v1270_v40 = vmul.f32 %v3326_v0, %v1244_v46  ;;  %vm3919_vm11 = vmor %vm1172_vm8, %vm1173_vm7 }
 0x22b   : > { %v3883_v8 = vpop.eup %2594  ;;  %v1169_v12 = vmul.f32 0.5, %v1168_v37  ;;  %v1271_v39 = vmul.f32 %v3326_v0, %v1245_v59  ;;  %v1259_v58 = vmul.f32 %v1225_v60, %v959_v16  ;;  %v1284_v46 = vmul.f32 %v3326_v0, %v1258_v51 }
 0x22c   : > { %v795_v14 = vpop.xlane.xlu0 %794  ;;  %v1177_v5 = vmul.f32 %v3883_v8, %v3791_v35  ;;  %vm1183_vm10 = vweird.f32 %v3883_v8  ;;  %v1316_v62 = vmax.f32 %v1291_v13, 0.0  ;;  %v1296_v9 = vadd.f32 %v3344_v54, %v1270_v40 }
 0x22d   : > { %v807_v17 = vpop.xlane.xlu2 %806  ;;  %v840_v34 = vmul.f32 %v795_v14, %v3261_v25  ;;  %v1170_v10 = vsub.f32 1.5, %v1169_v12  ;;  %v1297_v49 = vadd.f32 %v3344_v54, %v1271_v39  ;;  %v885_v2 = vmul.f32 %v3838_v33, %v3838_v33  ;;  %vm1184_vm12 = vmor %vm1182_vm9, %vm1183_vm10 }
 0x22e   : > { %v846_v42 = vmul.f32 %v807_v17, %v3261_v25  ;;  %v797_v63 = vpop.xlane.xlu1 %796  ;;  %v1178_v4 = vmul.f32 %v3883_v8, %v1177_v5  ;;  %v1340_v6 = vpack.c.bf16 %v1316_v62, %v1315_v44  ;;  %v1321_v26 = vmax.f32 %v1296_v9, 0.0 }
 0x22f   : > { %v890_v47 = vsub.f32 %v840_v34, %v865_v15  ;;  %v841_v24 = vmul.f32 %v797_v63, %v3261_v25  ;;  %v1171_v15 = vmul.f32 %v3846_v31, %v1170_v10  ;;  %v1322_v1 = vmax.f32 %v1297_v49, 0.0 }
 0x230   : > { %v896_v56 = vsub.f32 %v846_v42, %v871_v48  ;;  %v1179_v36 = vmul.f32 0.5, %v1178_v4  ;;  %1430 = vmatmul.bf16.gmra.mxu0 %v1340_v6  ;;  %v872_v14 = vmul.f32 %v3841_v29, %v3841_v29  ;;  %v1285_v17 = vmul.f32 %v3326_v0, %v1259_v58 }
 0x231   : > { %v915_v53 = vmax.f32 %v890_v47, 0.0  ;;  %v891_v32 = vsub.f32 %v841_v24, %v866_v61  ;;  %v1343_v59 = vpack.c.bf16 %v1322_v1, %v1321_v26  ;;  %v1310_v51 = vadd.f32 %v3344_v54, %v1284_v46 }
 0x232   : > { %v921_v19 = vmax.f32 %v896_v56, 0.0  ;;  %v1180_v38 = vsub.f32 1.5, %v1179_v36  ;;  %v1311_v11 = vadd.f32 %v3344_v54, %v1285_v17  ;;  %v955_v34 = vsub.f32 %v3236_v57, %v3729_v30 }
 0x233   : > { %v3901_v48 = vadd.f32 1e-05, %v915_v53  ;;  %v916_v45 = vmax.f32 %v891_v32, 0.0  ;;  %1445 = vmatmul.bf16.gmra.mxu1 %v1343_v59  ;;  %v1175_v42 = vsel %vm3919_vm11, %v3846_v31, %v1171_v15  ;;  %v1335_v5 = vmax.f32 %v1310_v51, 0.0 }
 0x234   : > { %v3903_v50 = vadd.f32 1e-05, %v921_v19  ;;  %v809_v61 = vpop.xlane.xlu0 %808  ;;  %v1181_v55 = vmul.f32 %v3883_v8, %v1180_v38  ;;  %v1336_v44 = vmax.f32 %v1311_v11, 0.0  ;;  %v1254_v12 = vmul.f32 %v1175_v42, %v954_v22 }
 0x235   : > { %2596 = vrsqrt.f32 %v3901_v48  ;;  %v3925_v16 = vadd.f32 1e-05, %v916_v45  ;;  %v847_v37 = vmul.f32 %v809_v61, %v3261_v25  ;;  %vm1032_vm14 = vweird.f32 %v3901_v48 }
 0x236   : > { %2598 = vrsqrt.f32 %v3903_v50  ;;  %v835_v60 = vpop.xlane.xlu1 %834  ;;  %v1185_v35 = vsel %vm1184_vm12, %v3883_v8, %v1181_v55  ;;  %v1350_v57 = vpack.c.bf16 %v1336_v44, %v1335_v5  ;;  %v1280_v31 = vmul.f32 %v3326_v0, %v1254_v12 }
 0x237   : > { %v860_v13 = vmul.f32 %v835_v60, %v3261_v25  ;;  %2600 = vrsqrt.f32 %v3925_v16  ;;  %v897_v63 = vsub.f32 %v847_v37, %v872_v14  ;;  %v1255_v62 = vmul.f32 %v1185_v35, %v955_v34 }
 0x238   : > { %1480 = vmatmul.bf16.gmra.mxu3 %v1350_v57  ;;  %v1306_v22 = vadd.f32 %v3344_v54, %v1280_v31  ;;  %vm1092_vm2 = vweird.f32 %v3903_v50  ;;  %vm1042_vm4 = vweird.f32 %v3925_v16  ;;  %v946_v37 = vsub.f32 %v3251_v18, %v3795_v41 }
 0x239   : > { %v910_v40 = vsub.f32 %v860_v13, %v885_v2  ;;  %v922_v30 = vmax.f32 %v897_v63, 0.0  ;;  %v1281_v8 = vmul.f32 %v3326_v0, %v1255_v62  ;;  %v940_v2 = vsub.f32 %v3246_v7, %v3774_v27 }
 0x23a   : > { %v1331_v26 = vmax.f32 %v1306_v22, 0.0  ;;  %v941_v27 = vsub.f32 %v3243_v3, %v3771_v21  ;;  %v947_v41 = vsub.f32 %v3257_v23, %v3841_v29  ;;  %v960_v57 = vsub.f32 %v3254_v20, %v3838_v33 }
 0x23b   : > { %v2597_v47 = vpop.eup %2596  ;;  %v935_v56 = vmax.f32 %v910_v40, 0.0  ;;  %v972_v9 = vadd.f32 1e-05, %v922_v30  ;;  %v1307_v6 = vadd.f32 %v3344_v54, %v1281_v8 }
 0x23c   : > { %v2599_v4 = vpop.eup %2598  ;;  %v1027_v24 = vmul.f32 %v2597_v47, %v3901_v48  ;;  %vm1033_vm13 = vweird.f32 %v2597_v47 }
 0x23d   : > { %v1087_v39 = vmul.f32 %v2599_v4, %v3903_v50  ;;  %v3949_v10 = vadd.f32 1e-05, %v935_v56  ;;  %v2601_v52 = vpop.eup %2600  ;;  %2602 = vrsqrt.f32 %v972_v9  ;;  %v1332_v15 = vmax.f32 %v1307_v6, 0.0  ;;  %vm1034_vm0 = vmor %vm1032_vm14, %vm1033_vm13 }
 0x23e   : > { %v1028_v28 = vmul.f32 %v2597_v47, %v1027_v24  ;;  %v1037_v19 = vmul.f32 %v2601_v52, %v3925_v16  ;;  %vm1093_vm15 = vweird.f32 %v2599_v4  ;;  %vm1043_vm1 = vweird.f32 %v2601_v52 }
 0x23f   : > { %v1088_v53 = vmul.f32 %v2599_v4, %v1087_v39  ;;  %2604 = vrsqrt.f32 %v3949_v10  ;;  %v1348_v1 = vpack.c.bf16 %v1332_v15, %v1331_v26  ;;  %vm3959_vm3 = vmor %vm1092_vm2, %vm1093_vm15  ;;  %vm1102_vm8 = vweird.f32 %v972_v9 }
 0x240   : > { %v1029_v36 = vmul.f32 0.5, %v1028_v28  ;;  %v1038_v49 = vmul.f32 %v2601_v52, %v1037_v19  ;;  %vm1044_vm5 = vmor %vm1042_vm4, %vm1043_vm1  ;;  %vm1232_vm10 = vweird.f32 %v3949_v10 }
 0x241   : > { %v1089_v32 = vmul.f32 0.5, %v1088_v53  ;;  %1470 = vmatmul.bf16.gmra.mxu2 %v1348_v1  ;;  %v3986_v53 = vld [vmem:[#allocation11] sm:$0xff] }
 0x242   : > { %v1030_v58 = vsub.f32 1.5, %v1029_v36  ;;  %v1039_v45 = vmul.f32 0.5, %v1038_v49  ;;  %v3989_v19 = vperm.slane %v3986_v53, 0 }
 0x243   : > { %v1090_v38 = vsub.f32 1.5, %v1089_v32  ;;  %v2603_v61 = vpop.eup %2602 }
 0x244   : > { %v1031_v46 = vmul.f32 %v2597_v47, %v1030_v58  ;;  %v1040_v17 = vsub.f32 1.5, %v1039_v45  ;;  %v1097_v55 = vmul.f32 %v2603_v61, %v972_v9  ;;  %vm1103_vm6 = vweird.f32 %v2603_v61 }
 0x245   : > { %v1091_v14 = vmul.f32 %v2599_v4, %v1090_v38  ;;  %v2605_v43 = vpop.eup %2604  ;;  %vm1104_vm9 = vmor %vm1102_vm8, %vm1103_vm6 }
 0x246   : > { %v1035_v59 = vsel %vm1034_vm0, %v2597_v47, %v1031_v46  ;;  %v1041_v48 = vmul.f32 %v2601_v52, %v1040_v17  ;;  %v1227_v51 = vmul.f32 %v2605_v43, %v3949_v10  ;;  %v1098_v11 = vmul.f32 %v2603_v61, %v1097_v55 }
 0x247   : > { %v1240_v7 = vmul.f32 %v1035_v59, %v940_v2  ;;  %v1095_v50 = vsel %vm3959_vm3, %v2599_v4, %v1091_v14  ;;  %vm1233_vm7 = vweird.f32 %v2605_v43 }
 0x248   : > { %v1228_v13 = vmul.f32 %v2605_v43, %v1227_v51  ;;  %v1045_v34 = vsel %vm1044_vm5, %v2601_v52, %v1041_v48  ;;  %v1099_v35 = vmul.f32 0.5, %v1098_v11  ;;  %v1246_v44 = vmul.f32 %v1095_v50, %v946_v37  ;;  %vm1234_vm11 = vmor %vm1232_vm10, %vm1233_vm7 }
 0x249   : > { %v1266_v42 = vmul.f32 %v3326_v0, %v1240_v7  ;;  %v1241_v16 = vmul.f32 %v1045_v34, %v941_v27 }
 0x24a   : > { %v1229_v5 = vmul.f32 0.5, %v1228_v13  ;;  %v1100_v63 = vsub.f32 1.5, %v1099_v35  ;;  %v1272_v62 = vmul.f32 %v3326_v0, %v1246_v44 }
 0x24b   : > { %v1267_v3 = vmul.f32 %v3326_v0, %v1241_v16  ;;  %v1292_v21 = vadd.f32 %v3344_v54, %v1266_v42 }
 0x24c   : > { %v1230_v40 = vsub.f32 1.5, %v1229_v5  ;;  %v1101_v12 = vmul.f32 %v2603_v61, %v1100_v63  ;;  %v1298_v23 = vadd.f32 %v3344_v54, %v1272_v62 }
 0x24d   : > { %v1293_v18 = vadd.f32 %v3344_v54, %v1267_v3  ;;  %v1317_v30 = vmax.f32 %v1292_v21, 0.0 }
 0x24e   : > { %v1231_v47 = vmul.f32 %v2605_v43, %v1230_v40  ;;  %v1105_v4 = vsel %vm1104_vm9, %v2603_v61, %v1101_v12  ;;  %v1323_v20 = vmax.f32 %v1298_v23, 0.0 }
 0x24f   : > { %v1318_v56 = vmax.f32 %v1293_v18, 0.0  ;;  %v1247_v24 = vmul.f32 %v1105_v4, %v947_v41 }
 0x250   : > { %v1235_v31 = vsel %vm1234_vm11, %v2605_v43, %v1231_v47 }
 0x251   : > { %v1341_v8 = vpack.c.bf16 %v1318_v56, %v1317_v30  ;;  %v1260_v39 = vmul.f32 %v1235_v31, %v960_v57  ;;  %v1273_v9 = vmul.f32 %v3326_v0, %v1247_v24 }
 0x253   : > { %1435 = vmatmul.bf16.gmra.mxu0 %v1341_v8  ;;  %v1286_v29 = vmul.f32 %v3326_v0, %v1260_v39  ;;  %v1299_v10 = vadd.f32 %v3344_v54, %v1273_v9 }
 0x255   : > { %v1312_v52 = vadd.f32 %v3344_v54, %v1286_v29  ;;  %v1324_v33 = vmax.f32 %v1299_v10, 0.0 }
 0x257   : > { %v1337_v28 = vmax.f32 %v1312_v52, 0.0  ;;  %v1344_v22 = vpack.c.bf16 %v1324_v33, %v1323_v20 }
 0x259   : > { %v1351_v6 = vpack.c.bf16 %v1337_v28, %v1337_v28  ;;  %1450 = vmatmul.bf16.gmra.mxu1 %v1344_v22 }
 0x25b   : > { %1485 = vmatmul.bf16.gmra.mxu3 %v1351_v6 }
 0x266   : > { %v1456_v15 = vpop.f32.mrf.mxu2 }
 0x267   : > { %v4007_v1 = vadd.f32 %v1456_v15, %v3989_v19 }
 0x269   : > { %v1577_v60 = vmul.f32 %v4007_v1, %v4007_v1 }
 0x26e   : > { %v1458_v48 = vpop.f32.mrf.mxu2 }
 0x26f   : > { %v4032_v7 = vadd.f32 %v1458_v48, %v3989_v19 }
 0x271   : > { %v1578_v5 = vmul.f32 %v4032_v7, %v4032_v7 }
 0x276   : > { %v1461_v63 = vpop.f32.mrf.mxu2 }
 0x277   : > { %v4060_v21 = vadd.f32 %v1461_v63, %v3989_v19 }
 0x279   : > { %v1579_v57 = vmul.f32 %v4060_v21, %v4060_v21 }
 0x27e   : > { %v1463_v4 = vpop.f32.mrf.mxu2 }
 0x27f   : > { %v4083_v31 = vadd.f32 %v1463_v4, %v3989_v19 }
 0x281   : > { %v1580_v33 = vmul.f32 %v4083_v31, %v4083_v31 }
 0x283   : > { %v1426_v36 = vpop.f32.mrf.mxu0 }
 0x284   : > { %v3992_v32 = vadd.f32 %v1426_v36, %v3989_v19 }
 0x286   : > { %1490 = vadd.xlane.f32.xlu2 %v3992_v32  ;;  %v1565_v0 = vmul.f32 %v3992_v32, %v3992_v32  ;;  %v1441_v54 = vpop.f32.mrf.mxu1 }
 0x287   : > { %v3998_v49 = vadd.f32 %v1441_v54, %v3989_v19 }
 0x288   : > { %1590 = vadd.xlane.f32.xlu0 %v1565_v0 }
 0x289   : > { %v1571_v26 = vmul.f32 %v3998_v49, %v3998_v49 }
 0x28b   : > { %v1428_v45 = vpop.f32.mrf.mxu0 }
 0x28c   : > { %v4011_v46 = vadd.f32 %v1428_v45, %v3989_v19 }
 0x28e   : > { %1502 = vadd.xlane.f32.xlu2 %v3998_v49  ;;  %v1566_v61 = vmul.f32 %v4011_v46, %v4011_v46  ;;  %v1443_v2 = vpop.f32.mrf.mxu1 }
 0x28f   : > { %v4020_v17 = vadd.f32 %v1443_v2, %v3989_v19 }
 0x290   : > { %1602 = vadd.xlane.f32.xlu0 %v1571_v26 }
 0x291   : > { %v1572_v55 = vmul.f32 %v4020_v17, %v4020_v17 }
 0x292   : > { %v1476_v58 = vpop.f32.mrf.mxu3 }
 0x293   : > { %v4004_v38 = vadd.f32 %v1476_v58, %v3989_v19 }
 0x295   : > { %1530 = vadd.xlane.f32.xlu1 %v4004_v38  ;;  %v1585_v14 = vmul.f32 %v4004_v38, %v4004_v38 }
 0x296   : > { %1514 = vadd.xlane.f32.xlu2 %v4007_v1 }
 0x298   : > { %1492 = vadd.xlane.f32.xlu0 %v4011_v46 }
 0x299   : > { %v1466_v9 = vpop.f32.mrf.mxu2 }
 0x29a   : > { %v1478_v43 = vpop.f32.mrf.mxu3  ;;  %v4109_v0 = vadd.f32 %v1466_v9, %v3989_v19 }
 0x29b   : > { %v4026_v59 = vadd.f32 %v1478_v43, %v3989_v19 }
 0x29d   : > { %1592 = vadd.xlane.f32.xlu1 %v1566_v61  ;;  %v1586_v13 = vmul.f32 %v4026_v59, %v4026_v59  ;;  %v1581_v61 = vmul.f32 %v4109_v0, %v4109_v0 }
 0x29e   : > { %1630 = vadd.xlane.f32.xlu2 %v1585_v14 }
 0x2a0   : > { %1504 = vadd.xlane.f32.xlu0 %v4020_v17 }
 0x2a1   : > { %v1468_v28 = vpop.f32.mrf.mxu2 }
 0x2a2   : > { %v4119_v58 = vadd.f32 %v1468_v28, %v3989_v19 }
 0x2a4   : > { %v1582_v2 = vmul.f32 %v4119_v58, %v4119_v58 }
 0x2a5   : > { %1604 = vadd.xlane.f32.xlu1 %v1572_v55 }
 0x2a6   : > { %1532 = vadd.xlane.f32.xlu2 %v4026_v59 }
 0x2a8   : > { %1614 = vadd.xlane.f32.xlu0 %v1577_v60 }
 0x2ad   : > { %v1431_v51 = vpop.f32.mrf.mxu0 }
 0x2ae   : > { %v4035_v27 = vadd.f32 %v1431_v51, %v3989_v19 }
 0x2b0   : > { %1494 = vadd.xlane.f32.xlu1 %v4035_v27  ;;  %1516 = vadd.xlane.f32.xlu0 %v4032_v7  ;;  %v1567_v11 = vmul.f32 %v4035_v27, %v4035_v27  ;;  %v1446_v50 = vpop.f32.mrf.mxu1 }
 0x2b1   : > { %v4042_v37 = vadd.f32 %v1446_v50, %v3989_v19 }
 0x2b2   : > { %1594 = vadd.xlane.f32.xlu2 %v1567_v11 }
 0x2b3   : > { %v1573_v34 = vmul.f32 %v4042_v37, %v4042_v37 }
 0x2b5   : > { %v1433_v42 = vpop.f32.mrf.mxu0 }
 0x2b6   : > { %v4055_v44 = vadd.f32 %v1433_v42, %v3989_v19 }
 0x2b8   : > { %1632 = vadd.xlane.f32.xlu0 %v1586_v13  ;;  %1506 = vadd.xlane.f32.xlu1 %v4042_v37  ;;  %v1448_v3 = vpop.f32.mrf.mxu1  ;;  %v1568_v40 = vmul.f32 %v4055_v44, %v4055_v44 }
 0x2b9   : > { %v4065_v12 = vadd.f32 %v1448_v3, %v3989_v19 }
 0x2ba   : > { %1606 = vadd.xlane.f32.xlu2 %v1573_v34 }
 0x2bb   : > { %v1481_v35 = vpop.f32.mrf.mxu3  ;;  %v1574_v62 = vmul.f32 %v4065_v12, %v4065_v12 }
 0x2bc   : > { %v4050_v16 = vadd.f32 %v1481_v35, %v3989_v19 }
 0x2c0   : > { %1616 = vadd.xlane.f32.xlu1 %v1578_v5  ;;  %1534 = vadd.xlane.f32.xlu0 %v4050_v16 }
 0x2c2   : > { %1496 = vadd.xlane.f32.xlu2 %v4055_v44 }
 0x2c3   : > { %v1483_v18 = vpop.f32.mrf.mxu3 }
 0x2c4   : > { %v4070_v41 = vadd.f32 %v1483_v18, %v3989_v19  ;;  %v1471_v54 = vpop.f32.mrf.mxu2 }
 0x2c5   : > { %v4116_v15 = vadd.f32 %v1471_v54, %v3989_v19 }
 0x2c7   : > { %v1583_v45 = vmul.f32 %v4116_v15, %v4116_v15 }
 0x2c8   : > { %1518 = vadd.xlane.f32.xlu1 %v4060_v21  ;;  %1596 = vadd.xlane.f32.xlu0 %v1568_v40 }
 0x2ca   : > { %1508 = vadd.xlane.f32.xlu2 %v4065_v12 }
 0x2cc   : > { %v1473_v55 = vpop.f32.mrf.mxu2 }
 0x2cd   : > { %v4134_v11 = vadd.f32 %v1473_v55, %v3989_v19 }
 0x2cf   : > { %v1584_v40 = vmul.f32 %v4134_v11, %v4134_v11 }
 0x2d0   : > { %v1436_v47 = vpop.f32.mrf.mxu0  ;;  %1536 = vadd.xlane.f32.xlu1 %v4070_v41  ;;  %1608 = vadd.xlane.f32.xlu0 %v1574_v62 }
 0x2d1   : > { %v4078_v30 = vadd.f32 %v1436_v47, %v3989_v19  ;;  %v1588_v47 = vmul.f32 %v4070_v41, %v4070_v41 }
 0x2d2   : > { %1618 = vadd.xlane.f32.xlu2 %v1579_v57 }
 0x2d3   : > { %v1569_v56 = vmul.f32 %v4078_v30, %v4078_v30 }
 0x2d6   : > { %v1451_v24 = vpop.f32.mrf.mxu1 }
 0x2d7   : > { %v4088_v8 = vadd.f32 %v1451_v24, %v3989_v19 }
 0x2d8   : > { %1498 = vadd.xlane.f32.xlu0 %v4078_v30  ;;  %1598 = vadd.xlane.f32.xlu1 %v1569_v56  ;;  %v1438_v10 = vpop.f32.mrf.mxu0 }
 0x2d9   : > { %v1575_v23 = vmul.f32 %v4088_v8, %v4088_v8  ;;  %v4098_v52 = vadd.f32 %v1438_v10, %v3989_v19 }
 0x2da   : > { %1520 = vadd.xlane.f32.xlu2 %v4083_v31 }
 0x2db   : > { %v1570_v22 = vmul.f32 %v4098_v52, %v4098_v52 }
 0x2de   : > { %v1486_v39 = vpop.f32.mrf.mxu3  ;;  %v1453_v6 = vpop.f32.mrf.mxu1 }
 0x2df   : > { %v4093_v29 = vadd.f32 %v1486_v39, %v3989_v19  ;;  %v4106_v36 = vadd.f32 %v1453_v6, %v3989_v19 }
 0x2e0   : > { %1510 = vadd.xlane.f32.xlu0 %v4088_v8  ;;  %1610 = vadd.xlane.f32.xlu1 %v1575_v23 }
 0x2e1   : > { %v1576_v26 = vmul.f32 %v4106_v36, %v4106_v36  ;;  %v1589_v3 = vmul.f32 %v4093_v29, %v4093_v29 }
 0x2e2   : > { %1538 = vadd.xlane.f32.xlu2 %v4093_v29 }
 0x2e6   : > { %v1488_v20 = vpop.f32.mrf.mxu3 }
 0x2e8   : > { %1620 = vadd.xlane.f32.xlu0 %v1580_v33  ;;  %1500 = vadd.xlane.f32.xlu1 %v4098_v52  ;;  %v1587_v33 = vmul.f32 %v4050_v16, %v4050_v16 }
 0x2ea   : > { %1600 = vadd.xlane.f32.xlu2 %v1570_v22 }
 0x2f0   : > { %1522 = vadd.xlane.f32.xlu0 %v4109_v0  ;;  %1512 = vadd.xlane.f32.xlu1 %v4106_v36 }
 0x2f2   : > { %1612 = vadd.xlane.f32.xlu2 %v1576_v26 }
 0x2f8   : > { %1626 = vadd.xlane.f32.xlu0 %v1583_v45  ;;  %1622 = vadd.xlane.f32.xlu1 %v1581_v61 }
 0x2f9   : > { %v1491_v14 = vpop.xlane.xlu2 %1490 }
 0x2fa   : > { %v4128_v43 = vmul.f32 %v1491_v14, %v3261_v25  ;;  %1624 = vadd.xlane.f32.xlu2 %v1582_v2 }
 0x2fb   : > { %v1591_v60 = vpop.xlane.xlu0 %1590 }
 0x2fc   : > { %v1665_v48 = vmul.f32 %v4128_v43, %v4128_v43  ;;  %v1640_v51 = vmul.f32 %v1591_v60, %v3261_v25  ;;  %v4166_v60 = vperm.slane %v3986_v53, 1 }
 0x2fe   : > { %v1690_v50 = vsub.f32 %v1640_v51, %v1665_v48 }
 0x300   : > { %v1715_v13 = vmax.f32 %v1690_v50, 0.0  ;;  %1528 = vadd.xlane.f32.xlu0 %v4134_v11  ;;  %1524 = vadd.xlane.f32.xlu1 %v4119_v58  ;;  %v1740_v50 = vsub.f32 %v3992_v32, %v4128_v43 }
 0x301   : > { %v1503_v34 = vpop.xlane.xlu2 %1502 }
 0x302   : > { %v1765_v42 = vadd.f32 1e-05, %v1715_v13  ;;  %v4139_v35 = vmul.f32 %v1503_v34, %v3261_v25  ;;  %1526 = vadd.xlane.f32.xlu2 %v4116_v15 }
 0x303   : > { %v1603_v5 = vpop.xlane.xlu0 %1602 }
 0x304   : > { %2606 = vrsqrt.f32 %v1765_v42  ;;  %v1671_v63 = vmul.f32 %v4139_v35, %v4139_v35  ;;  %v1646_v19 = vmul.f32 %v1603_v5, %v3261_v25  ;;  %vm1796_vm13 = vweird.f32 %v1765_v42 }
 0x306   : > { %v1696_v18 = vsub.f32 %v1646_v19, %v1671_v63  ;;  %v4171_v63 = vperm.slane %v3986_v53, 2 }
 0x308   : > { %v1531_v62 = vpop.xlane.xlu1 %1530  ;;  %1638 = vadd.xlane.f32.xlu0 %v1589_v3  ;;  %1628 = vadd.xlane.f32.xlu1 %v1584_v40  ;;  %v1721_v57 = vmax.f32 %v1696_v18, 0.0 }
 0x309   : > { %v1515_v56 = vpop.xlane.xlu2 %1514  ;;  %v4155_v20 = vmul.f32 %v1531_v62, %v3261_v25 }
 0x30a   : > { %v2607_v4 = vpop.eup %2606  ;;  %1636 = vadd.xlane.f32.xlu2 %v1588_v47  ;;  %v1771_v39 = vadd.f32 1e-05, %v1721_v57 }
 0x30b   : > { %v1791_v24 = vmul.f32 %v2607_v4, %v1765_v42  ;;  %v1493_v9 = vpop.xlane.xlu0 %1492  ;;  %vm1797_vm12 = vweird.f32 %v2607_v4  ;;  %v1685_v61 = vmul.f32 %v4155_v20, %v4155_v20 }
 0x30c   : > { %v4152_v23 = vmul.f32 %v1493_v9, %v3261_v25  ;;  %2608 = vrsqrt.f32 %v1771_v39  ;;  %vm1798_vm14 = vmor %vm1796_vm13, %vm1797_vm12  ;;  %vm1856_vm0 = vweird.f32 %v1771_v39 }
 0x30d   : > { %v1792_v10 = vmul.f32 %v2607_v4, %v1791_v24 }
 0x30e   : > { %v1666_v6 = vmul.f32 %v4152_v23, %v4152_v23 }
 0x30f   : > { %v1793_v28 = vmul.f32 0.5, %v1792_v10  ;;  %v4184_v10 = vmul.f32 %v1515_v56, %v3261_v25 }
 0x310   : > { %v1593_v22 = vpop.xlane.xlu1 %1592  ;;  %1634 = vadd.xlane.f32.xlu1 %v1587_v33 }
 0x311   : > { %v1641_v54 = vmul.f32 %v1593_v22, %v3261_v25  ;;  %v1794_v26 = vsub.f32 1.5, %v1793_v28  ;;  %v1631_v45 = vpop.xlane.xlu2 %1630  ;;  %v1677_v56 = vmul.f32 %v4184_v10, %v4184_v10 }
 0x312   : > { %v1660_v14 = vmul.f32 %v1631_v45, %v3261_v25  ;;  %v2609_v55 = vpop.eup %2608 }
 0x313   : > { %v1691_v2 = vsub.f32 %v1641_v54, %v1666_v6  ;;  %v1795_v48 = vmul.f32 %v2607_v4, %v1794_v26  ;;  %v1505_v51 = vpop.xlane.xlu0 %1504  ;;  %v1851_v13 = vmul.f32 %v2609_v55, %v1771_v39  ;;  %vm1857_vm15 = vweird.f32 %v2609_v55 }
 0x314   : > { %v1710_v5 = vsub.f32 %v1660_v14, %v1685_v61  ;;  %v4174_v3 = vmul.f32 %v1505_v51, %v3261_v25  ;;  %v1746_v54 = vsub.f32 %v3998_v49, %v4139_v35  ;;  %vm1858_vm1 = vmor %vm1856_vm0, %vm1857_vm15 }
 0x315   : > { %v1716_v34 = vmax.f32 %v1691_v2, 0.0  ;;  %v1799_v19 = vsel %vm1798_vm14, %v2607_v4, %v1795_v48  ;;  %v1852_v18 = vmul.f32 %v2609_v55, %v1851_v13 }
 0x316   : > { %v2040_v40 = vmul.f32 %v1799_v19, %v1740_v50  ;;  %v1735_v47 = vmax.f32 %v1710_v5, 0.0  ;;  %v1672_v43 = vmul.f32 %v4174_v3, %v4174_v3 }
 0x317   : > { %v1766_v62 = vadd.f32 1e-05, %v1716_v34  ;;  %v1853_v24 = vmul.f32 0.5, %v1852_v18 }
 0x318   : > { %v1605_v42 = vpop.xlane.xlu1 %1604  ;;  %v2066_v57 = vmul.f32 %v4166_v60, %v2040_v40  ;;  %v4177_v32 = vadd.f32 1e-05, %v1735_v47 }
 0x319   : > { %2610 = vrsqrt.f32 %v1766_v62  ;;  %v1647_v53 = vmul.f32 %v1605_v42, %v3261_v25  ;;  %v1854_v9 = vsub.f32 1.5, %v1853_v24  ;;  %v1533_v45 = vpop.xlane.xlu2 %1532  ;;  %vm1806_vm3 = vweird.f32 %v1766_v62 }
 0x31a   : > { %v2092_v4 = vadd.f32 %v4171_v63, %v2066_v57  ;;  %2612 = vrsqrt.f32 %v4177_v32  ;;  %vm1996_vm6 = vweird.f32 %v4177_v32 }
 0x31b   : > { %v1697_v33 = vsub.f32 %v1647_v53, %v1672_v43  ;;  %v1615_v28 = vpop.xlane.xlu0 %1614  ;;  %v1855_v6 = vmul.f32 %v2609_v55, %v1854_v9 }
 0x31c   : > { %v2117_v22 = vmax.f32 %v2092_v4, 0.0  ;;  %v1652_v61 = vmul.f32 %v1615_v28, %v3261_v25  ;;  %v1741_v28 = vsub.f32 %v4011_v46, %v4152_v23  ;;  %v1760_v46 = vsub.f32 %v4004_v38, %v4155_v20 }
 0x31d   : > { %v1722_v26 = vmax.f32 %v1697_v33, 0.0  ;;  %v1859_v14 = vsel %vm1858_vm1, %v2609_v55, %v1855_v6  ;;  %v4209_v6 = vmul.f32 %v1533_v45, %v3261_v25  ;;  %v1747_v23 = vsub.f32 %v4020_v17, %v4174_v3 }
 0x31e   : > { %2142 = vst [vmem:[#allocation12] sm:$0xff] %v2117_v22  ;;  %v2046_v48 = vmul.f32 %v1859_v14, %v1746_v54  ;;  %v1702_v13 = vsub.f32 %v1652_v61, %v1677_v56 }
 0x31f   : > { %v2611_v2 = vpop.eup %2610  ;;  %v4192_v50 = vadd.f32 1e-05, %v1722_v26 }
 0x320   : > { %v1801_v51 = vmul.f32 %v2611_v2, %v1766_v62  ;;  %v2613_v39 = vpop.eup %2612  ;;  %v2072_v34 = vmul.f32 %v4166_v60, %v2046_v48  ;;  %v1727_v5 = vmax.f32 %v1702_v13, 0.0  ;;  %vm1807_vm2 = vweird.f32 %v2611_v2 }
 0x321   : > { %2614 = vrsqrt.f32 %v4192_v50  ;;  %v1991_v35 = vmul.f32 %v2613_v39, %v4177_v32  ;;  %vm1808_vm4 = vmor %vm1806_vm3, %vm1807_vm2  ;;  %vm1997_vm5 = vweird.f32 %v2613_v39  ;;  %vm1866_vm8 = vweird.f32 %v4192_v50 }
 0x322   : > { %v1802_v49 = vmul.f32 %v2611_v2, %v1801_v51  ;;  %v2098_v19 = vadd.f32 %v4171_v63, %v2072_v34  ;;  %v4198_v42 = vadd.f32 1e-05, %v1727_v5  ;;  %vm1998_vm7 = vmor %vm1996_vm6, %vm1997_vm5  ;;  %v1686_v62 = vmul.f32 %v4209_v6, %v4209_v6 }
 0x323   : > { %v1495_v40 = vpop.xlane.xlu1 %1494  ;;  %v1517_v18 = vpop.xlane.xlu0 %1516  ;;  %v1992_v47 = vmul.f32 %v2613_v39, %v1991_v35 }
 0x324   : > { %v1803_v55 = vmul.f32 0.5, %v1802_v49  ;;  %v4201_v57 = vmul.f32 %v1495_v40, %v3261_v25  ;;  %v2123_v24 = vmax.f32 %v2098_v19, 0.0  ;;  %2616 = vrsqrt.f32 %v4198_v42 }
 0x325   : > { %v1595_v53 = vpop.xlane.xlu2 %1594  ;;  %v1993_v4 = vmul.f32 0.5, %v1992_v47  ;;  %vm1916_vm12 = vweird.f32 %v4198_v42 }
 0x326   : > { %v1804_v43 = vsub.f32 1.5, %v1803_v55  ;;  %v1667_v9 = vmul.f32 %v4201_v57, %v4201_v57  ;;  %2148 = vst [vmem:[#allocation12 + $0x30] sm:$0xff] %v2123_v24  ;;  %v1642_v61 = vmul.f32 %v1595_v53, %v3261_v25 }
 0x327   : > { %v2615_v33 = vpop.eup %2614  ;;  %v1994_v54 = vsub.f32 1.5, %v1993_v4 }
 0x328   : > { %v1805_v22 = vmul.f32 %v2611_v2, %v1804_v43  ;;  %v1861_v26 = vmul.f32 %v2615_v33, %v4192_v50  ;;  %v1692_v13 = vsub.f32 %v1642_v61, %v1667_v9  ;;  %vm1867_vm9 = vweird.f32 %v2615_v33 }
 0x329   : > { %v1995_v48 = vmul.f32 %v2613_v39, %v1994_v54  ;;  %v4232_v43 = vmul.f32 %v1517_v18, %v3261_v25  ;;  %vm1868_vm10 = vmor %vm1866_vm8, %vm1867_vm9 }
 0x32a   : > { %v1809_v14 = vsel %vm1808_vm4, %v2611_v2, %v1805_v22  ;;  %v1862_v51 = vmul.f32 %v2615_v33, %v1861_v26  ;;  %v2617_v34 = vpop.eup %2616  ;;  %v1717_v5 = vmax.f32 %v1692_v13, 0.0 }
 0x32b   : > { %v2041_v56 = vmul.f32 %v1809_v14, %v1741_v28  ;;  %v1633_v45 = vpop.xlane.xlu0 %1632  ;;  %v1507_v2 = vpop.xlane.xlu1 %1506  ;;  %v1999_v49 = vsel %vm1998_vm7, %v2613_v39, %v1995_v48  ;;  %v1911_v38 = vmul.f32 %v2617_v34, %v4198_v42  ;;  %vm1917_vm11 = vweird.f32 %v2617_v34 }
 0x32c   : > { %v1863_v35 = vmul.f32 0.5, %v1862_v51  ;;  %v2060_v19 = vmul.f32 %v1999_v49, %v1760_v46  ;;  %v1661_v20 = vmul.f32 %v1633_v45, %v3261_v25  ;;  %v4225_v40 = vadd.f32 1e-05, %v1717_v5  ;;  %vm1918_vm13 = vmor %vm1916_vm12, %vm1917_vm11 }
 0x32d   : > { %v2067_v32 = vmul.f32 %v4166_v60, %v2041_v56  ;;  %v1607_v17 = vpop.xlane.xlu2 %1606  ;;  %v4228_v47 = vmul.f32 %v1507_v2, %v3261_v25  ;;  %v1912_v39 = vmul.f32 %v2617_v34, %v1911_v38  ;;  %v1678_v50 = vmul.f32 %v4232_v43, %v4232_v43 }
 0x32e   : > { %v1864_v55 = vsub.f32 1.5, %v1863_v35  ;;  %v2086_v24 = vmul.f32 %v4166_v60, %v2060_v19  ;;  %v1711_v53 = vsub.f32 %v1661_v20, %v1686_v62  ;;  %2618 = vrsqrt.f32 %v4225_v40 }
 0x32f   : > { %v2093_v3 = vadd.f32 %v4171_v63, %v2067_v32  ;;  %v1648_v28 = vmul.f32 %v1607_v17, %v3261_v25  ;;  %v1913_v54 = vmul.f32 0.5, %v1912_v39  ;;  %v1673_v61 = vmul.f32 %v4228_v47, %v4228_v47 }
 0x330   : > { %v1865_v9 = vmul.f32 %v2615_v33, %v1864_v55  ;;  %v2112_v22 = vadd.f32 %v4171_v63, %v2086_v24  ;;  %v1736_v26 = vmax.f32 %v1711_v53, 0.0  ;;  %v1752_v49 = vsub.f32 %v4007_v1, %v4184_v10 }
 0x331   : > { %v2118_v4 = vmax.f32 %v2093_v3, 0.0  ;;  %v1914_v48 = vsub.f32 1.5, %v1913_v54  ;;  %v1698_v62 = vsub.f32 %v1648_v28, %v1673_v61  ;;  %vm1816_vm15 = vweird.f32 %v4225_v40 }
 0x332   : > { %v1869_v18 = vsel %vm1868_vm10, %v2615_v33, %v1865_v9  ;;  %v2137_v14 = vmax.f32 %v2112_v22, 0.0  ;;  %v4242_v51 = vadd.f32 1e-05, %v1736_v26 }
 0x333   : > { %2143 = vst [vmem:[#allocation12 + $0x8] sm:$0xff] %v2118_v4  ;;  %v2047_v56 = vmul.f32 %v1869_v18, %v1747_v23  ;;  %v1617_v13 = vpop.xlane.xlu1 %1616  ;;  %v4244_v46 = vpop.xlane.xlu0 %1534  ;;  %v1915_v32 = vmul.f32 %v2617_v34, %v1914_v48  ;;  %v1723_v35 = vmax.f32 %v1698_v62, 0.0  ;;  %v1742_v62 = vsub.f32 %v4035_v27, %v4201_v57 }
 0x334   : > { %v1653_v45 = vmul.f32 %v1617_v13, %v3261_v25  ;;  %2162 = vst [vmem:[#allocation12 + $0xa0] sm:$0xff] %v2137_v14  ;;  %2620 = vrsqrt.f32 %v4242_v51  ;;  %v2619_v23 = vpop.eup %2618  ;;  %vm2006_vm2 = vweird.f32 %v4242_v51 }
 0x335   : > { %v2073_v2 = vmul.f32 %v4166_v60, %v2047_v56  ;;  %v1497_v33 = vpop.xlane.xlu2 %1496  ;;  %v1919_v38 = vsel %vm1918_vm13, %v2617_v34, %v1915_v32  ;;  %v1811_v20 = vmul.f32 %v2619_v23, %v4225_v40  ;;  %v4257_v3 = vadd.f32 1e-05, %v1723_v35 }
 0x336   : > { %v1703_v5 = vsub.f32 %v1653_v45, %v1678_v50  ;;  %v2052_v17 = vmul.f32 %v1919_v38, %v1752_v49  ;;  %v4260_v39 = vmul.f32 %v1497_v33, %v3261_v25  ;;  %vm1817_vm14 = vweird.f32 %v2619_v23 }
 0x337   : > { %v2099_v19 = vadd.f32 %v4171_v63, %v2073_v2  ;;  %v1812_v24 = vmul.f32 %v2619_v23, %v1811_v20  ;;  %2622 = vrsqrt.f32 %v4257_v3  ;;  %vm1818_vm0 = vmor %vm1816_vm15, %vm1817_vm14  ;;  %vm1876_vm4 = vweird.f32 %v4257_v3 }
 0x338   : > { %v1728_v42 = vmax.f32 %v1703_v5, 0.0  ;;  %v2078_v1 = vmul.f32 %v4166_v60, %v2052_v17  ;;  %v1668_v26 = vmul.f32 %v4260_v39, %v4260_v39  ;;  %v1761_v5 = vsub.f32 %v4026_v59, %v4209_v6 }
 0x339   : > { %v2124_v55 = vmax.f32 %v2099_v19, 0.0  ;;  %v1813_v34 = vmul.f32 0.5, %v1812_v24 }
 0x33a   : > { %v4264_v10 = vadd.f32 1e-05, %v1728_v42  ;;  %v2621_v53 = vpop.eup %2620  ;;  %v2104_v28 = vadd.f32 %v4171_v63, %v2078_v1 }
 0x33b   : > { %2149 = vst [vmem:[#allocation12 + $0x38] sm:$0xff] %v2124_v55  ;;  %v1519_v4 = vpop.xlane.xlu1 %1518  ;;  %v1597_v9 = vpop.xlane.xlu0 %1596  ;;  %v2001_v22 = vmul.f32 %v2621_v53, %v4242_v51  ;;  %v1814_v54 = vsub.f32 1.5, %v1813_v34  ;;  %vm2007_vm1 = vweird.f32 %v2621_v53 }
 0x33c   : > { %2624 = vrsqrt.f32 %v4264_v10  ;;  %v1643_v61 = vmul.f32 %v1597_v9, %v3261_v25  ;;  %v2129_v14 = vmax.f32 %v2104_v28, 0.0  ;;  %v4289_v55 = vmul.f32 %v1519_v4, %v3261_v25  ;;  %vm2008_vm3 = vmor %vm2006_vm2, %vm2007_vm1 }
 0x33d   : > { %v1509_v18 = vpop.xlane.xlu2 %1508  ;;  %v2002_v56 = vmul.f32 %v2621_v53, %v2001_v22  ;;  %v1815_v48 = vmul.f32 %v2619_v23, %v1814_v54  ;;  %v2623_v50 = vpop.eup %2622  ;;  %vm1926_vm8 = vweird.f32 %v4264_v10 }
 0x33e   : > { %v1693_v13 = vsub.f32 %v1643_v61, %v1668_v26  ;;  %2154 = vst [vmem:[#allocation12 + $0x60] sm:$0xff] %v2129_v14  ;;  %v1871_v32 = vmul.f32 %v2623_v50, %v4257_v3  ;;  %v4277_v49 = vmul.f32 %v1509_v18, %v3261_v25  ;;  %vm1877_vm5 = vweird.f32 %v2623_v50 }
 0x33f   : > { %v2003_v45 = vmul.f32 0.5, %v2002_v56  ;;  %v1819_v2 = vsel %vm1818_vm0, %v2619_v23, %v1815_v48  ;;  %v1679_v61 = vmul.f32 %v4289_v55, %v4289_v55  ;;  %vm1878_vm7 = vmor %vm1876_vm4, %vm1877_vm5 }
 0x340   : > { %v1718_v33 = vmax.f32 %v1693_v13, 0.0  ;;  %v2042_v40 = vmul.f32 %v1819_v2, %v1742_v62  ;;  %v1872_v38 = vmul.f32 %v2623_v50, %v1871_v32  ;;  %v1674_v51 = vmul.f32 %v4277_v49, %v4277_v49 }
 0x341   : > { %v2004_v19 = vsub.f32 1.5, %v2003_v45 }
 0x342   : > { %v2625_v35 = vpop.eup %2624  ;;  %v4283_v57 = vadd.f32 1e-05, %v1718_v33  ;;  %v2068_v17 = vmul.f32 %v4166_v60, %v2042_v40  ;;  %v1873_v6 = vmul.f32 0.5, %v1872_v38  ;;  %v1753_v38 = vsub.f32 %v4032_v7, %v4232_v43 }
 0x343   : > { %v1921_v27 = vmul.f32 %v2625_v35, %v4264_v10  ;;  %v4285_v23 = vpop.xlane.xlu1 %1536  ;;  %v1609_v20 = vpop.xlane.xlu0 %1608  ;;  %v2005_v42 = vmul.f32 %v2621_v53, %v2004_v19  ;;  %vm1927_vm6 = vweird.f32 %v2625_v35 }
 0x344   : > { %v1649_v59 = vmul.f32 %v1609_v20, %v3261_v25  ;;  %2626 = vrsqrt.f32 %v4283_v57  ;;  %v2094_v34 = vadd.f32 %v4171_v63, %v2068_v17  ;;  %v1874_v4 = vsub.f32 1.5, %v1873_v6  ;;  %vm1928_vm9 = vmor %vm1926_vm8, %vm1927_vm6 }
 0x345   : > { %v1922_v24 = vmul.f32 %v2625_v35, %v1921_v27  ;;  %v1619_v1 = vpop.xlane.xlu2 %1618  ;;  %v2009_v9 = vsel %vm2008_vm3, %v2621_v53, %v2005_v42  ;;  %v1748_v53 = vsub.f32 %v4042_v37, %v4228_v47  ;;  %vm1826_vm11 = vweird.f32 %v4283_v57 }
 0x346   : > { %v2061_v28 = vmul.f32 %v2009_v9, %v1761_v5  ;;  %v1699_v54 = vsub.f32 %v1649_v59, %v1674_v51  ;;  %v2119_v26 = vmax.f32 %v2094_v34, 0.0  ;;  %v1654_v18 = vmul.f32 %v1619_v1, %v3261_v25 }
 0x347   : > { %v1923_v22 = vmul.f32 0.5, %v1922_v24  ;;  %v1875_v56 = vmul.f32 %v2623_v50, %v1874_v4 }
 0x348   : > { %v2087_v14 = vmul.f32 %v4166_v60, %v2061_v28  ;;  %v1724_v13 = vmax.f32 %v1699_v54, 0.0  ;;  %2144 = vst [vmem:[#allocation12 + $0x10] sm:$0xff] %v2119_v26  ;;  %v1704_v62 = vsub.f32 %v1654_v18, %v1679_v61 }
 0x349   : > { %v1924_v48 = vsub.f32 1.5, %v1923_v22  ;;  %v1879_v32 = vsel %vm1878_vm7, %v2623_v50, %v1875_v56 }
 0x34a   : > { %v2627_v45 = vpop.eup %2626  ;;  %v2113_v2 = vadd.f32 %v4171_v63, %v2087_v14  ;;  %v4308_v5 = vadd.f32 1e-05, %v1724_v13  ;;  %v2048_v37 = vmul.f32 %v1879_v32, %v1748_v53  ;;  %v1729_v3 = vmax.f32 %v1704_v62, 0.0 }
 0x34b   : > { %v1925_v33 = vmul.f32 %v2625_v35, %v1924_v48  ;;  %v1499_v40 = vpop.xlane.xlu0 %1498  ;;  %v1599_v19 = vpop.xlane.xlu1 %1598  ;;  %v1821_v47 = vmul.f32 %v2627_v45, %v4283_v57  ;;  %vm1827_vm10 = vweird.f32 %v2627_v45  ;;  %v1743_v14 = vsub.f32 %v4055_v44, %v4260_v39 }
 0x34c   : > { %v2138_v10 = vmax.f32 %v2113_v2, 0.0  ;;  %2628 = vrsqrt.f32 %v4308_v5  ;;  %v2074_v50 = vmul.f32 %v4166_v60, %v2048_v37  ;;  %v4316_v59 = vadd.f32 1e-05, %v1729_v3  ;;  %vm1828_vm12 = vmor %vm1826_vm11, %vm1827_vm10 }
 0x34d   : > { %v1929_v27 = vsel %vm1928_vm9, %v2625_v35, %v1925_v33  ;;  %v1521_v20 = vpop.xlane.xlu2 %1520  ;;  %v1822_v42 = vmul.f32 %v2627_v45, %v1821_v47  ;;  %v4319_v7 = vmul.f32 %v1499_v40, %v3261_v25  ;;  %v1644_v43 = vmul.f32 %v1599_v19, %v3261_v25 }
 0x34e   : > { %v2053_v17 = vmul.f32 %v1929_v27, %v1753_v38  ;;  %2163 = vst [vmem:[#allocation12 + $0xa8] sm:$0xff] %v2138_v10  ;;  %v2100_v6 = vadd.f32 %v4171_v63, %v2074_v50  ;;  %2630 = vrsqrt.f32 %v4316_v59  ;;  %v4342_v44 = vmul.f32 %v1521_v20, %v3261_v25 }
 0x34f   : > { %v1823_v35 = vmul.f32 0.5, %v1822_v42  ;;  %v1669_v51 = vmul.f32 %v4319_v7, %v4319_v7  ;;  %vm1886_vm14 = vweird.f32 %v4308_v5  ;;  %vm1936_vm1 = vweird.f32 %v4316_v59 }
 0x350   : > { %v2079_v24 = vmul.f32 %v4166_v60, %v2053_v17  ;;  %v2125_v1 = vmax.f32 %v2100_v6, 0.0  ;;  %v1680_v27 = vmul.f32 %v4342_v44, %v4342_v44 }
 0x351   : > { %v1824_v9 = vsub.f32 1.5, %v1823_v35  ;;  %v1694_v4 = vsub.f32 %v1644_v43, %v1669_v51  ;;  %v1749_v35 = vsub.f32 %v4065_v12, %v4277_v49  ;;  %v1754_v12 = vsub.f32 %v4060_v21, %v4289_v55 }
 0x352   : > { %v2105_v34 = vadd.f32 %v4171_v63, %v2079_v24  ;;  %v2629_v28 = vpop.eup %2628  ;;  %2150 = vst [vmem:[#allocation12 + $0x40] sm:$0xff] %v2125_v1 }
 0x353   : > { %v1511_v22 = vpop.xlane.xlu0 %1510  ;;  %v1611_v54 = vpop.xlane.xlu1 %1610  ;;  %v1825_v61 = vmul.f32 %v2627_v45, %v1824_v9  ;;  %v1881_v18 = vmul.f32 %v2629_v28, %v4308_v5  ;;  %v1719_v56 = vmax.f32 %v1694_v4, 0.0  ;;  %vm1887_vm13 = vweird.f32 %v2629_v28 }
 0x354   : > { %v2130_v26 = vmax.f32 %v2105_v34, 0.0  ;;  %v4333_v48 = vmul.f32 %v1511_v22, %v3261_v25  ;;  %v2631_v53 = vpop.eup %2630  ;;  %v1650_v32 = vmul.f32 %v1611_v54, %v3261_v25  ;;  %vm1888_vm15 = vmor %vm1886_vm14, %vm1887_vm13 }
 0x355   : > { %v4335_v13 = vpop.xlane.xlu2 %1538  ;;  %v1829_v62 = vsel %vm1828_vm12, %v2627_v45, %v1825_v61  ;;  %v1882_v2 = vmul.f32 %v2629_v28, %v1881_v18  ;;  %v1931_v57 = vmul.f32 %v2631_v53, %v4316_v59  ;;  %v4339_v40 = vadd.f32 1e-05, %v1719_v56 }
 0x356   : > { %2155 = vst [vmem:[#allocation12 + $0x68] sm:$0xff] %v2130_v26  ;;  %v2043_v33 = vmul.f32 %v1829_v62, %v1743_v14  ;;  %v1675_v19 = vmul.f32 %v4333_v48, %v4333_v48  ;;  %vm1937_vm0 = vweird.f32 %v2631_v53 }
 0x357   : > { %v1883_v39 = vmul.f32 0.5, %v1882_v2  ;;  %v1932_v37 = vmul.f32 %v2631_v53, %v1931_v57  ;;  %2632 = vrsqrt.f32 %v4339_v40  ;;  %vm1938_vm2 = vmor %vm1936_vm1, %vm1937_vm0  ;;  %vm1836_vm4 = vweird.f32 %v4339_v40 }
 0x358   : > { %v2069_v38 = vmul.f32 %v4166_v60, %v2043_v33  ;;  %v1700_v47 = vsub.f32 %v1650_v32, %v1675_v19 }
 0x359   : > { %v1884_v45 = vsub.f32 1.5, %v1883_v39  ;;  %v1933_v10 = vmul.f32 0.5, %v1932_v37 }
 0x35a   : > { %v2095_v3 = vadd.f32 %v4171_v63, %v2069_v38  ;;  %v1725_v42 = vmax.f32 %v1700_v47, 0.0 }
 0x35b   : > { %v1621_v20 = vpop.xlane.xlu0 %1620  ;;  %v1501_v50 = vpop.xlane.xlu1 %1500  ;;  %v1885_v17 = vmul.f32 %v2629_v28, %v1884_v45  ;;  %v1934_v51 = vsub.f32 1.5, %v1933_v10 }
 0x35c   : > { %v1655_v43 = vmul.f32 %v1621_v20, %v3261_v25  ;;  %v4354_v6 = vmul.f32 %v1501_v50, %v3261_v25  ;;  %v2120_v24 = vmax.f32 %v2095_v3, 0.0  ;;  %v4359_v34 = vadd.f32 1e-05, %v1725_v42 }
 0x35d   : > { %v1601_v5 = vpop.xlane.xlu2 %1600  ;;  %v1889_v1 = vsel %vm1888_vm15, %v2629_v28, %v1885_v17  ;;  %v2633_v4 = vpop.eup %2632  ;;  %v1935_v54 = vmul.f32 %v2631_v53, %v1934_v51  ;;  %v1744_v17 = vsub.f32 %v4078_v30, %v4319_v7  ;;  %v4399_v7 = vmul.f32 %v4285_v23, %v3261_v25 }
 0x35e   : > { %v1705_v9 = vsub.f32 %v1655_v43, %v1680_v27  ;;  %2145 = vst [vmem:[#allocation12 + $0x18] sm:$0xff] %v2120_v24  ;;  %v2049_v22 = vmul.f32 %v1889_v1, %v1749_v35  ;;  %v1670_v26 = vmul.f32 %v4354_v6, %v4354_v6  ;;  %v1645_v61 = vmul.f32 %v1601_v5, %v3261_v25 }
 0x35f   : > { %v1831_v49 = vmul.f32 %v2633_v4, %v4339_v40  ;;  %2634 = vrsqrt.f32 %v4359_v34  ;;  %v1939_v28 = vsel %vm1938_vm2, %v2631_v53, %v1935_v54  ;;  %vm1837_vm3 = vweird.f32 %v2633_v4 }
 0x360   : > { %v2075_v59 = vmul.f32 %v4166_v60, %v2049_v22  ;;  %v1730_v18 = vmax.f32 %v1705_v9, 0.0  ;;  %v1695_v14 = vsub.f32 %v1645_v61, %v1670_v26  ;;  %v2054_v56 = vmul.f32 %v1939_v28, %v1754_v12  ;;  %vm1838_vm5 = vmor %vm1836_vm4, %vm1837_vm3 }
 0x361   : > { %v1832_v62 = vmul.f32 %v2633_v4, %v1831_v49  ;;  %v4393_v5 = vmul.f32 %v4244_v46, %v3261_v25  ;;  %v4408_v28 = vmul.f32 %v4335_v13, %v3261_v25  ;;  %vm1896_vm7 = vweird.f32 %v4359_v34 }
 0x362   : > { %v2101_v2 = vadd.f32 %v4171_v63, %v2075_v59  ;;  %v4370_v32 = vadd.f32 1e-05, %v1730_v18  ;;  %v1720_v33 = vmax.f32 %v1695_v14, 0.0  ;;  %v2080_v21 = vmul.f32 %v4166_v60, %v2054_v56 }
 0x363   : > { %v1523_v57 = vpop.xlane.xlu0 %1522  ;;  %v1513_v39 = vpop.xlane.xlu1 %1512  ;;  %v1833_v55 = vmul.f32 0.5, %v1832_v62 }
 0x364   : > { %v2126_v19 = vmax.f32 %v2101_v2, 0.0  ;;  %2636 = vrsqrt.f32 %v4370_v32  ;;  %v4374_v38 = vadd.f32 1e-05, %v1720_v33  ;;  %v4377_v53 = vmul.f32 %v1513_v39, %v3261_v25 }
 0x365   : > { %v1613_v37 = vpop.xlane.xlu2 %1612  ;;  %v2635_v45 = vpop.eup %2634  ;;  %v2106_v47 = vadd.f32 %v4171_v63, %v2080_v21  ;;  %v1834_v3 = vsub.f32 1.5, %v1833_v55  ;;  %v4384_v50 = vmul.f32 %v1523_v57, %v3261_v25  ;;  %v1750_v33 = vsub.f32 %v4088_v8, %v4333_v48 }
 0x366   : > { %2151 = vst [vmem:[#allocation12 + $0x48] sm:$0xff] %v2126_v19  ;;  %v1891_v10 = vmul.f32 %v2635_v45, %v4359_v34  ;;  %2638 = vrsqrt.f32 %v4374_v38  ;;  %v1676_v43 = vmul.f32 %v4377_v53, %v4377_v53  ;;  %v1651_v24 = vmul.f32 %v1613_v37, %v3261_v25 }
 0x367   : > { %v2131_v27 = vmax.f32 %v2106_v47, 0.0  ;;  %v1835_v20 = vmul.f32 %v2633_v4, %v1834_v3  ;;  %vm1897_vm6 = vweird.f32 %v2635_v45  ;;  %v4422_v34 = vmul.f32 %v4399_v7, %v4399_v7 }
 0x368   : > { %v1892_v42 = vmul.f32 %v2635_v45, %v1891_v10  ;;  %v1701_v9 = vsub.f32 %v1651_v24, %v1676_v43  ;;  %vm1898_vm8 = vmor %vm1896_vm7, %vm1897_vm6  ;;  %v1755_v8 = vsub.f32 %v4083_v31, %v4342_v44  ;;  %vm1946_vm10 = vweird.f32 %v4370_v32 }
 0x369   : > { %2156 = vst [vmem:[#allocation12 + $0x70] sm:$0xff] %v2131_v27  ;;  %v1839_v35 = vsel %vm1838_vm5, %v2633_v4, %v1835_v20  ;;  %v1681_v4 = vmul.f32 %v4384_v50, %v4384_v50  ;;  %vm1846_vm13 = vweird.f32 %v4374_v38 }
 0x36a   : > { %v2637_v51 = vpop.eup %2636  ;;  %v2044_v40 = vmul.f32 %v1839_v35, %v1744_v17  ;;  %v1893_v1 = vmul.f32 0.5, %v1892_v42  ;;  %v1726_v49 = vmax.f32 %v1701_v9, 0.0  ;;  %v1689_v17 = vmul.f32 %v4408_v28, %v4408_v28 }
 0x36b   : > { %v4395_v22 = vpop.xlane.xlu0 %1626  ;;  %v1623_v30 = vpop.xlane.xlu1 %1622  ;;  %v1941_v54 = vmul.f32 %v2637_v51, %v4370_v32  ;;  %vm1947_vm9 = vweird.f32 %v2637_v51  ;;  %v1745_v9 = vsub.f32 %v4098_v52, %v4354_v6 }
 0x36c   : > { %v1656_v26 = vmul.f32 %v1623_v30, %v3261_v25  ;;  %v2639_v61 = vpop.eup %2638  ;;  %v2070_v46 = vmul.f32 %v4166_v60, %v2044_v40  ;;  %v1894_v12 = vsub.f32 1.5, %v1893_v1  ;;  %v4413_v2 = vadd.f32 1e-05, %v1726_v49  ;;  %vm1948_vm12 = vmor %vm1946_vm10, %vm1947_vm9 }
 0x36d   : > { %v1625_v59 = vpop.xlane.xlu2 %1624  ;;  %v1942_v23 = vmul.f32 %v2637_v51, %v1941_v54  ;;  %v1841_v18 = vmul.f32 %v2639_v61, %v4374_v38  ;;  %vm1847_vm11 = vweird.f32 %v2639_v61  ;;  %v1658_v52 = vmul.f32 %v4395_v22, %v3261_v25 }
 0x36e   : > { %v1706_v14 = vsub.f32 %v1656_v26, %v1681_v4  ;;  %v2096_v56 = vadd.f32 %v4171_v63, %v2070_v46  ;;  %v1895_v62 = vmul.f32 %v2635_v45, %v1894_v12  ;;  %2640 = vrsqrt.f32 %v4413_v2  ;;  %vm1848_vm14 = vmor %vm1846_vm13, %vm1847_vm11 }
 0x36f   : > { %v1943_v57 = vmul.f32 0.5, %v1942_v23  ;;  %v1842_v39 = vmul.f32 %v2639_v61, %v1841_v18  ;;  %v1657_v38 = vmul.f32 %v1625_v59, %v3261_v25  ;;  %vm1906_vm15 = vweird.f32 %v4413_v2 }
 0x370   : > { %v1731_v21 = vmax.f32 %v1706_v14, 0.0  ;;  %v2121_v13 = vmax.f32 %v2096_v56, 0.0  ;;  %v1899_v55 = vsel %vm1898_vm8, %v2635_v45, %v1895_v62 }
 0x371   : > { %v2050_v19 = vmul.f32 %v1899_v55, %v1750_v33  ;;  %v1944_v37 = vsub.f32 1.5, %v1943_v57  ;;  %v1843_v47 = vmul.f32 0.5, %v1842_v39 }
 0x372   : > { %v4418_v3 = vadd.f32 1e-05, %v1731_v21  ;;  %2146 = vst [vmem:[#allocation12 + $0x20] sm:$0xff] %v2121_v13 }
 0x373   : > { %v1529_v48 = vpop.xlane.xlu0 %1528  ;;  %v1525_v45 = vpop.xlane.xlu1 %1524  ;;  %v2076_v10 = vmul.f32 %v4166_v60, %v2050_v19  ;;  %v1945_v27 = vmul.f32 %v2637_v51, %v1944_v37  ;;  %v1844_v20 = vsub.f32 1.5, %v1843_v47 }
 0x374   : > { %2642 = vrsqrt.f32 %v4418_v3  ;;  %v4434_v31 = vmul.f32 %v1529_v48, %v3261_v25  ;;  %v4437_v44 = vmul.f32 %v1525_v45, %v3261_v25  ;;  %v2641_v40 = vpop.eup %2640  ;;  %vm1956_vm3 = vweird.f32 %v4418_v3 }
 0x375   : > { %v1527_v32 = vpop.xlane.xlu2 %1526  ;;  %v2102_v42 = vadd.f32 %v4171_v63, %v2076_v10  ;;  %v1949_v43 = vsel %vm1948_vm12, %v2637_v51, %v1945_v27  ;;  %v1845_v24 = vmul.f32 %v2639_v61, %v1844_v20  ;;  %v1751_v51 = vsub.f32 %v4106_v36, %v4377_v53 }
 0x376   : > { %v4441_v35 = vmul.f32 %v1527_v32, %v3261_v25  ;;  %v2055_v1 = vmul.f32 %v1949_v43, %v1755_v8  ;;  %v1682_v30 = vmul.f32 %v4437_v44, %v4437_v44  ;;  %v1901_v26 = vmul.f32 %v2641_v40, %v4413_v2 }
 0x377   : > { %v2127_v54 = vmax.f32 %v2102_v42, 0.0  ;;  %v1849_v4 = vsel %vm1848_vm14, %v2639_v61, %v1845_v24  ;;  %v1684_v61 = vmul.f32 %v4434_v31, %v4434_v31  ;;  %vm1907_vm0 = vweird.f32 %v2641_v40 }
 0x378   : > { %v2081_v46 = vmul.f32 %v4166_v60, %v2055_v1  ;;  %v2045_v12 = vmul.f32 %v1849_v4, %v1745_v9  ;;  %v1707_v6 = vsub.f32 %v1657_v38, %v1682_v30  ;;  %v1902_v59 = vmul.f32 %v2641_v40, %v1901_v26  ;;  %vm1908_vm2 = vmor %vm1906_vm15, %vm1907_vm0 }
 0x379   : > { %2152 = vst [vmem:[#allocation12 + $0x50] sm:$0xff] %v2127_v54  ;;  %v1683_v36 = vmul.f32 %v4441_v35, %v4441_v35  ;;  %v1756_v2 = vsub.f32 %v4109_v0, %v4384_v50 }
 0x37a   : > { %v2643_v49 = vpop.eup %2642  ;;  %v2107_v53 = vadd.f32 %v4171_v63, %v2081_v46  ;;  %v2071_v23 = vmul.f32 %v4166_v60, %v2045_v12  ;;  %v1903_v56 = vmul.f32 0.5, %v1902_v59  ;;  %v1732_v62 = vmax.f32 %v1707_v6, 0.0 }
 0x37b   : > { %v1951_v18 = vmul.f32 %v2643_v49, %v4418_v3  ;;  %v1639_v22 = vpop.xlane.xlu0 %1638  ;;  %v1629_v14 = vpop.xlane.xlu1 %1628  ;;  %v1708_v33 = vsub.f32 %v1658_v52, %v1683_v36  ;;  %vm1957_vm1 = vweird.f32 %v2643_v49  ;;  %v1687_v3 = vmul.f32 %v4393_v5, %v4393_v5 }
 0x37c   : > { %v1664_v57 = vmul.f32 %v1639_v22, %v3261_v25  ;;  %v2132_v39 = vmax.f32 %v2107_v53, 0.0  ;;  %v2097_v21 = vadd.f32 %v4171_v63, %v2071_v23  ;;  %v1659_v55 = vmul.f32 %v1629_v14, %v3261_v25  ;;  %vm1958_vm4 = vmor %vm1956_vm3, %vm1957_vm1 }
 0x37d   : > { %v1952_v13 = vmul.f32 %v2643_v49, %v1951_v18  ;;  %v1637_v19 = vpop.xlane.xlu2 %1636  ;;  %v1904_v37 = vsub.f32 1.5, %v1903_v56  ;;  %v4466_v47 = vadd.f32 1e-05, %v1732_v62  ;;  %v1733_v8 = vmax.f32 %v1708_v33, 0.0 }
 0x37e   : > { %v1714_v48 = vsub.f32 %v1664_v57, %v1689_v17  ;;  %2157 = vst [vmem:[#allocation12 + $0x78] sm:$0xff] %v2132_v39  ;;  %v2122_v45 = vmax.f32 %v2097_v21, 0.0  ;;  %v1709_v27 = vsub.f32 %v1659_v55, %v1684_v61  ;;  %v1663_v20 = vmul.f32 %v1637_v19, %v3261_v25 }
 0x37f   : > { %v1953_v10 = vmul.f32 0.5, %v1952_v13  ;;  %v1905_v32 = vmul.f32 %v2641_v40, %v1904_v37  ;;  %2644 = vrsqrt.f32 %v4466_v47  ;;  %v4470_v42 = vadd.f32 1e-05, %v1733_v8 }
 0x380   : > { %2147 = vst [vmem:[#allocation12 + $0x28] sm:$0xff] %v2122_v45  ;;  %v1739_v24 = vmax.f32 %v1714_v48, 0.0  ;;  %v1734_v17 = vmax.f32 %v1709_v27, 0.0  ;;  %v1713_v1 = vsub.f32 %v1663_v20, %v4422_v34  ;;  %v1764_v14 = vsub.f32 %v4093_v29, %v4408_v28 }
 0x381   : > { %v1954_v43 = vsub.f32 1.5, %v1953_v10  ;;  %v1909_v9 = vsel %vm1908_vm2, %v2641_v40, %v1905_v32  ;;  %2646 = vrsqrt.f32 %v4470_v42  ;;  %v1759_v39 = vsub.f32 %v4134_v11, %v4434_v31 }
 0x382   : > { %v2051_v38 = vmul.f32 %v1909_v9, %v1751_v51  ;;  %v4478_v54 = vadd.f32 1e-05, %v1739_v24  ;;  %v4480_v4 = vadd.f32 1e-05, %v1734_v17  ;;  %v1738_v46 = vmax.f32 %v1713_v1, 0.0 }
 0x383   : > { %v1955_v30 = vmul.f32 %v2643_v49, %v1954_v43  ;;  %v1635_v26 = vpop.xlane.xlu1 %1634  ;;  %vm1966_vm6 = vweird.f32 %v4466_v47  ;;  %v1757_v45 = vsub.f32 %v4119_v58, %v4437_v44  ;;  %v1758_v10 = vsub.f32 %v4116_v15, %v4441_v35 }
 0x384   : > { %v1662_v34 = vmul.f32 %v1635_v26, %v3261_v25  ;;  %v2077_v40 = vmul.f32 %v4166_v60, %v2051_v38  ;;  %2648 = vrsqrt.f32 %v4478_v54  ;;  %v4491_v6 = vadd.f32 1e-05, %v1738_v46 }
 0x385   : > { %v1959_v51 = vsel %vm1958_vm4, %v2643_v49, %v1955_v30  ;;  %v2645_v12 = vpop.eup %2644  ;;  %2650 = vrsqrt.f32 %v4480_v4  ;;  %vm1976_vm9 = vweird.f32 %v4470_v42  ;;  %vm2036_vm11 = vweird.f32 %v4478_v54 }
 0x386   : > { %v2056_v52 = vmul.f32 %v1959_v51, %v1756_v2  ;;  %v2103_v0 = vadd.f32 %v4171_v63, %v2077_v40  ;;  %v1961_v50 = vmul.f32 %v2645_v12, %v4466_v47  ;;  %v1712_v59 = vsub.f32 %v1662_v34, %v1687_v3 }
 0x387   : > { %v2647_v25 = vpop.eup %2646  ;;  %2652 = vrsqrt.f32 %v4491_v6  ;;  %vm1967_vm5 = vweird.f32 %v2645_v12  ;;  %vm1986_vm14 = vweird.f32 %v4480_v4  ;;  %vm2026_vm2 = vweird.f32 %v4491_v6 }
 0x388   : > { %v2082_v61 = vmul.f32 %v4166_v60, %v2056_v52  ;;  %v2128_v36 = vmax.f32 %v2103_v0, 0.0  ;;  %v1962_v49 = vmul.f32 %v2645_v12, %v1961_v50  ;;  %v1971_v53 = vmul.f32 %v2647_v25, %v4470_v42  ;;  %vm1968_vm8 = vmor %vm1966_vm6, %vm1967_vm5 }
 0x389   : > { %v1737_v18 = vmax.f32 %v1712_v59, 0.0  ;;  %vm1977_vm7 = vweird.f32 %v2647_v25 }
 0x38a   : > { %v2108_v23 = vadd.f32 %v4171_v63, %v2082_v61  ;;  %v2649_v22 = vpop.eup %2648  ;;  %2153 = vst [vmem:[#allocation12 + $0x58] sm:$0xff] %v2128_v36  ;;  %v1963_v56 = vmul.f32 0.5, %v1962_v49  ;;  %v1972_v62 = vmul.f32 %v2647_v25, %v1971_v53  ;;  %vm1978_vm10 = vmor %vm1976_vm9, %vm1977_vm7 }
 0x38b   : > { %v2651_v33 = vpop.eup %2650  ;;  %v2031_v21 = vmul.f32 %v2649_v22, %v4478_v54  ;;  %v4504_v13 = vadd.f32 1e-05, %v1737_v18  ;;  %vm2037_vm12 = vweird.f32 %v2649_v22 }
 0x38c   : > { %v2133_v57 = vmax.f32 %v2108_v23, 0.0  ;;  %v1964_v55 = vsub.f32 1.5, %v1963_v56  ;;  %v1973_v19 = vmul.f32 0.5, %v1972_v62  ;;  %v1981_v37 = vmul.f32 %v2651_v33, %v4480_v4  ;;  %vm2038_vm15 = vmor %vm2036_vm11, %vm2037_vm12 }
 0x38d   : > { %v2653_v8 = vpop.eup %2652  ;;  %v2032_v29 = vmul.f32 %v2649_v22, %v2031_v21  ;;  %2654 = vrsqrt.f32 %v4504_v13  ;;  %vm1987_vm13 = vweird.f32 %v2651_v33  ;;  %v1763_v4 = vsub.f32 %v4070_v41, %v4399_v7 }
 0x38e   : > { %2158 = vst [vmem:[#allocation12 + $0x80] sm:$0xff] %v2133_v57  ;;  %v1965_v28 = vmul.f32 %v2645_v12, %v1964_v55  ;;  %v1974_v48 = vsub.f32 1.5, %v1973_v19  ;;  %v1982_v11 = vmul.f32 %v2651_v33, %v1981_v37  ;;  %v2021_v31 = vmul.f32 %v2653_v8, %v4491_v6  ;;  %vm1988_vm1 = vmor %vm1986_vm14, %vm1987_vm13 }
 0x38f   : > { %v2033_v27 = vmul.f32 0.5, %v2032_v29  ;;  %vm2027_vm0 = vweird.f32 %v2653_v8  ;;  %vm2016_vm5 = vweird.f32 %v4504_v13 }
 0x390   : > { %v1969_v47 = vsel %vm1968_vm8, %v2645_v12, %v1965_v28  ;;  %v1975_v20 = vmul.f32 %v2647_v25, %v1974_v48  ;;  %v1983_v32 = vmul.f32 0.5, %v1982_v11  ;;  %v2022_v43 = vmul.f32 %v2653_v8, %v2021_v31  ;;  %vm2028_vm3 = vmor %vm2026_vm2, %vm2027_vm0 }
 0x391   : > { %v2057_v24 = vmul.f32 %v1969_v47, %v1757_v45  ;;  %v2034_v17 = vsub.f32 1.5, %v2033_v27 }
 0x392   : > { %v1979_v1 = vsel %vm1978_vm10, %v2647_v25, %v1975_v20  ;;  %v1984_v58 = vsub.f32 1.5, %v1983_v32  ;;  %v2023_v44 = vmul.f32 0.5, %v2022_v43 }
 0x393   : > { %v2655_v9 = vpop.eup %2654  ;;  %v2083_v15 = vmul.f32 %v4166_v60, %v2057_v24  ;;  %v2058_v35 = vmul.f32 %v1979_v1, %v1758_v10  ;;  %v2035_v42 = vmul.f32 %v2649_v22, %v2034_v17 }
 0x394   : > { %v1985_v38 = vmul.f32 %v2651_v33, %v1984_v58  ;;  %v2024_v30 = vsub.f32 1.5, %v2023_v44  ;;  %v2011_v26 = vmul.f32 %v2655_v9, %v4504_v13  ;;  %vm2017_vm4 = vweird.f32 %v2655_v9 }
 0x395   : > { %v2109_v54 = vadd.f32 %v4171_v63, %v2083_v15  ;;  %v2084_v2 = vmul.f32 %v4166_v60, %v2058_v35  ;;  %v2039_v46 = vsel %vm2038_vm15, %v2649_v22, %v2035_v42  ;;  %v1762_v22 = vsub.f32 %v4050_v16, %v4393_v5  ;;  %vm2018_vm6 = vmor %vm2016_vm5, %vm2017_vm4 }
 0x396   : > { %v2064_v34 = vmul.f32 %v2039_v46, %v1764_v14  ;;  %v1989_v3 = vsel %vm1988_vm1, %v2651_v33, %v1985_v38  ;;  %v2025_v40 = vmul.f32 %v2653_v8, %v2024_v30  ;;  %v2012_v51 = vmul.f32 %v2655_v9, %v2011_v26 }
 0x397   : > { %v2134_v12 = vmax.f32 %v2109_v54, 0.0  ;;  %v2110_v52 = vadd.f32 %v4171_v63, %v2084_v2  ;;  %v2059_v0 = vmul.f32 %v1989_v3, %v1759_v39 }
 0x398   : > { %v2090_v50 = vmul.f32 %v4166_v60, %v2064_v34  ;;  %v2029_v59 = vsel %vm2028_vm3, %v2653_v8, %v2025_v40  ;;  %v2013_v25 = vmul.f32 0.5, %v2012_v51 }
 0x399   : > { %2159 = vst [vmem:[#allocation12 + $0x88] sm:$0xff] %v2134_v12  ;;  %v2135_v61 = vmax.f32 %v2110_v52, 0.0  ;;  %v2085_v6 = vmul.f32 %v4166_v60, %v2059_v0  ;;  %v2063_v36 = vmul.f32 %v2029_v59, %v1763_v4 }
 0x39a   : > { %v2116_v49 = vadd.f32 %v4171_v63, %v2090_v50  ;;  %v2014_v53 = vsub.f32 1.5, %v2013_v25 }
 0x39b   : > { %2160 = vst [vmem:[#allocation12 + $0x90] sm:$0xff] %v2135_v61  ;;  %v2111_v41 = vadd.f32 %v4171_v63, %v2085_v6  ;;  %v2089_v7 = vmul.f32 %v4166_v60, %v2063_v36 }
 0x39c   : > { %v2141_v23 = vmax.f32 %v2116_v49, 0.0  ;;  %v2015_v18 = vmul.f32 %v2655_v9, %v2014_v53 }
 0x39d   : > { %v2136_v14 = vmax.f32 %v2111_v41, 0.0  ;;  %v2115_v56 = vadd.f32 %v4171_v63, %v2089_v7 }
 0x39e   : > { %2166 = vst [vmem:[#allocation12 + $0xc0] sm:$0xff] %v2141_v23  ;;  %v2019_v62 = vsel %vm2018_vm6, %v2655_v9, %v2015_v18 }
 0x39f   : > { %2161 = vst [vmem:[#allocation12 + $0x98] sm:$0xff] %v2136_v14  ;;  %v2140_v33 = vmax.f32 %v2115_v56, 0.0  ;;  %v2062_v57 = vmul.f32 %v2019_v62, %v1762_v22 }
 0x3a1   : > { %2165 = vst [vmem:[#allocation12 + $0xb8] sm:$0xff] %v2140_v33  ;;  %v2088_v39 = vmul.f32 %v4166_v60, %v2062_v57 }
 0x3a3   : > { %v2114_v21 = vadd.f32 %v4171_v63, %v2088_v39 }
 0x3a5   : > { %v2139_v55 = vmax.f32 %v2114_v21, 0.0 }
 0x3a7   : > { %2164 = vst [vmem:[#allocation12 + $0xb0] sm:$0xff] %v2139_v55 }
 0x3a8 PF: > { %p2491_p3 = scmp.eq.s32.totalorder %s2974_s24, 1  ;;  %s2177_s6 = sshll.u32 %s4566_s5, 4  ;;  %s2178_s6 = int_to_ptr.hbm [resolvable:$true] %s2177_s6 }
 0x3a9   : > { %s2912_s30 = smov [#allocation12]   ;;  %s2913_s18 = smov 128  }
 0x3aa   : > { %s2175_s17 = sshll.u32 %s2912_s30, 4  ;;  %s2914_s7 = smov 8   ;;  %s2176_s17 = int_to_ptr.vmem [resolvable:$true] %s2175_s17 }
 0x3ab   : > { %2464 = dma.vmem_to_hbm [thread:$0]  (%p2491_p3), %s2176_s17, 3200, %s2178_s6, [#allocation5], %s2913_s18, %s2913_s18, %s2914_s7  }
 0x3ac   : > { %2875 = dma.done.wait (%p2491_p3), [#allocation5], 3200  }
 0x3ad   : > { %2877 = vsyncadd (%p2491_p3), [#allocation5], 4294964096 }
 0x3ae PF: > { %s23_s23 = sadd.s32 1, %s2900_s23   ;;  %s4629_s24 = sld [smem:[#allocation18_spill]] }
 0x3af   : > { %p20_p4 = scmp.ge.s32.totalorder %s23_s23, 4   ;;  %s4630_s18 = smov %s2884_s19 }
 0x3b0   : > { %s4631_s19 = smov %s2888_s20  ;;  %s4632_s20 = smov %s3044_s29 }
 0x3b1   : > { %s4633_s21 = smov %s2896_s22  ;;  %22 = sbr.rel (!%p20_p4) target bundleno = 13 (0xd), region = 111 }
 0x3b4   : > { %s4634_s22 = smov %s4629_s24 }
 0x3b6   :  { %2194 = vsyncpa [#allocation4], 1 }
 0x3b7   :  { %2196 = vsyncpa [#allocation4 + $0x1], 1 }
 0x3b8   :  { %2197 = vsyncpa [#allocation7], 1 }
 0x3b9   :  { %2199 = vsyncpa [#allocation7 + $0x1], 1 }
 0x3ba   :  { %2200 = vsyncpa [#allocation10], 1 }
 0x3bb   :  { %2201 = vsyncpa [#allocation5], 1 }
 0x3bc   :  { %2203 = vsyncpa [#allocation5 + $0x1], 1 }

</bundles_post_ra>
